<compile_context>
chip_gen: v6e
topology: v6e:2x2x1
jax: 0.10.0
libtpu: 0.0.40
codegen_flags: <defaults>
</compile_context>

<pallas_src>
import functools

import jax
import jax.numpy as jnp
from jax.experimental import pallas as pl
from jax.experimental.pallas import tpu as pltpu


def _round_up(x, m):
    return ((x + m - 1) // m) * m


def _vmem_capacity_bytes():
    try:
        return int(pltpu.get_tpu_info().vmem_capacity_bytes)
    except Exception:
        return 64 * 1024 * 1024          # v7x per-TC size; conservative floor


def _footprint_bytes(tm, C, H, hk):
    """Approximate VMEM footprint for a given hidden-chunk size."""
    n_hchunks = H // hk
    w_bufs = 1 if n_hchunks == 1 else 2              # resident vs. pipelined
    weights = (C * hk * 2 + hk * C * 2 + hk * 4) * w_bufs + C * 4
    io = 2 * (tm * C * 4) * 2                        # x tile + out tile, 2 bufs each
    inter = tm * hk * 6                              # f32 ReLU interm. + bf16 copy
    return weights + io + inter


def _pick_hidden_chunk(C, H, tm, budget):
    """hk == H (resident weights) if it fits; else the largest 128-aligned divisor."""
    if _footprint_bytes(tm, C, H, H) <= budget:
        return H
    best = None
    for hk in range(128, H, 128):
        if H % hk == 0 and _footprint_bytes(tm, C, H, hk) <= budget:
            best = hk
    if best is not None:
        return best
    return 128 if H % 128 == 0 else H                # last resort


def _ffn_kernel(x_ref, w1_ref, b1_ref, w2_ref, b2_ref, o_ref, *, n_hchunks):
    # x_ref : (tm, C)  f32 token tile           w1_ref: (C, hk) bf16
    # b1_ref: (1, hk)  f32                      w2_ref: (hk, C) bf16
    # b2_ref: (1, C)   f32                      o_ref : (tm, C) f32
    x = x_ref[...].astype(jnp.bfloat16)                        # in-kernel cast (VPU)
    h = jnp.dot(x, w1_ref[...], preferred_element_type=jnp.float32)   # MXU, f32 acc
    h = jnp.maximum(h + b1_ref[...], 0.0)                      # bias + ReLU (f32)
    partial = jnp.dot(h.astype(jnp.bfloat16), w2_ref[...],
                      preferred_element_type=jnp.float32)

    if n_hchunks == 1:
        # Single hidden step: write the result directly, no scratch / no RMW.
        o_ref[...] = (partial + b2_ref[...]).astype(o_ref.dtype)
    else:
        hi = pl.program_id(1)

        @pl.when(hi == 0)
        def _():
            o_ref[...] = (partial + b2_ref[...]).astype(o_ref.dtype)

        @pl.when(hi > 0)
        def _():
            o_ref[...] += partial.astype(o_ref.dtype)


@functools.partial(jax.jit, static_argnames=("tm",))
def feed_forward(x, w1, b1, w2, b2, *, tm=256):
    """x: (B, T, C) f32.  w1: (C, 4C), w2: (4C, C) ideally already bf16.

    Returns (B, T, C) f32 (bf16 MXU matmuls, f32 accumulation)."""
    B, T, C = x.shape
    H = w1.shape[1]                       # 4 * C
    M = B * T

    # Row tile: big (MXU-friendly), never larger than the sublane-padded token
    # count, and split so the grid has >= 2 row steps when M allows it (v7x TCs).
    tm_eff = min(tm, _round_up(M, 8))
    if pl.cdiv(M, tm_eff) == 1 and M > 8:
        tm_eff = _round_up(pl.cdiv(M, 2), 8)
    n_rows = pl.cdiv(M, tm_eff)           # partial last block allowed (no padding)

    capacity = _vmem_capacity_bytes()
    budget = (min(capacity, 128 * 1024 * 1024) * 3) // 4
    hk = _pick_hidden_chunk(C, H, tm_eff, budget)
    n_hchunks = H // hk

    footprint = _footprint_bytes(tm_eff, C, H, hk)
    vmem_limit = int(min(capacity, max(32 * 1024 * 1024, footprint + 8 * 1024 * 1024)))

    # Operands: x stays f32 (cast in-kernel); weights should already be bf16
    # (astype is a no-op then), biases stay f32.
    x2d = x.reshape(M, C)
    w1_bf = w1.astype(jnp.bfloat16)
    w2_bf = w2.astype(jnp.bfloat16)
    b1_2d = b1.reshape(1, H).astype(jnp.float32)
    b2_2d = b2.reshape(1, C).astype(jnp.float32)

    cost = pl.CostEstimate(
        flops=4 * M * C * H,                                  # two matmuls, 2*M*C*H each
        transcendentals=0,
        bytes_accessed=(x2d.size * 4 + w1_bf.size * 2 + w2_bf.size * 2
                        + b1_2d.size * 4 + b2_2d.size * 4 + M * C * 4),
    )

    def resident(shape):
        # Grid-invariant block; single-buffer to halve its VMEM footprint.
        return pl.BlockSpec(shape, lambda i, h: (0, 0), pipeline_mode=pl.Buffered(1))

    if n_hchunks == 1:
        w1_spec = resident((C, H))
        b1_spec = resident((1, H))
        w2_spec = resident((H, C))
    else:
        # Stream weight blocks over the hidden axis (pipelined, default 2 buffers).
        w1_spec = pl.BlockSpec((C, hk), lambda i, h: (0, h))
        b1_spec = pl.BlockSpec((1, hk), lambda i, h: (0, h))
        w2_spec = pl.BlockSpec((hk, C), lambda i, h: (h, 0))

    out2d = pl.pallas_call(
        functools.partial(_ffn_kernel, n_hchunks=n_hchunks),
        out_shape=jax.ShapeDtypeStruct((M, C), x.dtype),
        grid_spec=pltpu.PrefetchScalarGridSpec(
            num_scalar_prefetch=0,
            grid=(n_rows, n_hchunks),
            in_specs=[
                pl.BlockSpec((tm_eff, C), lambda i, h: (i, 0)),   # x tile (pipelined)
                w1_spec,                                          # W1 (bf16)
                b1_spec,                                          # b1 (f32)
                w2_spec,                                          # W2 (bf16)
                resident((1, C)),                                 # b2 (f32)
            ],
            out_specs=pl.BlockSpec((tm_eff, C), lambda i, h: (i, 0)),
        ),
        compiler_params=pltpu.CompilerParams(
            dimension_semantics=("parallel", "arbitrary"),
            vmem_limit_bytes=vmem_limit,
        ),
        cost_estimate=cost,
    )(x2d, w1_bf, b1_2d, w2_bf, b2_2d)

    return out2d.reshape(B, T, C)


def init_params(key, n_embd):
    """Deterministic init mimicking nn.Linear's U(-1/sqrt(fan_in), 1/sqrt(fan_in))."""
    k1, k2, k3, k4 = jax.random.split(key, 4)
    hidden = 4 * n_embd
    bound1 = 1.0 / jnp.sqrt(n_embd)
    bound2 = 1.0 / jnp.sqrt(hidden)
    w1 = jax.random.uniform(k1, (n_embd, hidden), jnp.float32, -bound1, bound1)
    b1 = jax.random.uniform(k2, (hidden,), jnp.float32, -bound1, bound1)
    w2 = jax.random.uniform(k3, (hidden, n_embd), jnp.float32, -bound2, bound2)
    b2 = jax.random.uniform(k4, (n_embd,), jnp.float32, -bound2, bound2)
    return w1, b1, w2, b2


if __name__ == "__main__":
    n_embd = 384          # matches the module's global
    B, T = 2, 8

    key = jax.random.PRNGKey(0)
    kx, kp = jax.random.split(key)
    x = jax.random.normal(kx, (B, T, n_embd), jnp.float32)
    w1, b1, w2, b2 = init_params(kp, n_embd)

    # Pre-cast weights to bf16 ONCE (outside the jitted call); biases stay f32.
    w1_bf = w1.astype(jnp.bfloat16)
    w2_bf = w2.astype(jnp.bfloat16)

    out = feed_forward(x, w1_bf, b1, w2_bf, b2)
    out = jax.block_until_ready(out)
    assert out.shape == (B, T, n_embd)

    # Reference 1: same bf16-matmul / f32-accumulate path in plain JAX (tight tol).
    x2d = x.reshape(-1, n_embd)
    h_ref = jnp.maximum(
        jnp.dot(x2d.astype(jnp.bfloat16), w1_bf,
                preferred_element_type=jnp.float32) + b1, 0.0)
    ref_bf16 = (jnp.dot(h_ref.astype(jnp.bfloat16), w2_bf,
                        preferred_element_type=jnp.float32) + b2).reshape(B, T, n_embd)
    assert jnp.allclose(out, ref_bf16, atol=2e-3, rtol=2e-3), "mismatch vs bf16 reference"

    # Reference 2: full f32 math (eval-mode dropout == identity), loose tolerance
    # covering bf16 quantization of inputs/weights.
    ref_f32 = (jnp.maximum(x @ w1 + b1, 0.0) @ w2 + b2)
    assert jnp.allclose(out, ref_f32, atol=5e-2, rtol=5e-2), "mismatch vs f32 reference"

    print("KERNEL_OK")
</pallas_src>

<mosaic_0001>
module attributes {stable_mosaic.version = 11 : i64} {
  func.func @_ffn_kernel(%arg0: i32, %arg1: i32, %arg2: memref<8x384xf32, #tpu.memory_space<vmem>>, %arg3: memref<384x1536xbf16, #tpu.memory_space<vmem>>, %arg4: memref<1x1536xf32, #tpu.memory_space<vmem>>, %arg5: memref<1536x384xbf16, #tpu.memory_space<vmem>>, %arg6: memref<1x384xf32, #tpu.memory_space<vmem>>, %arg7: memref<8x384xf32, #tpu.memory_space<vmem>>) attributes {dimension_semantics = [#tpu.dimension_semantics<parallel>, #tpu.dimension_semantics<arbitrary>], iteration_bounds = array<i64: 2, 1>, scalar_prefetch = 0 : i64, scratch_operands = 0 : i64, tpu.core_type = #tpu.core_type<tc>, window_params = [{transform_indices = @transform_0, window_bounds = array<i64: 8, 384>}, {pipeline_mode = #tpu.pipeline_mode<synchronous>, transform_indices = @transform_1, window_bounds = array<i64: 384, 1536>}, {pipeline_mode = #tpu.pipeline_mode<synchronous>, transform_indices = @transform_2, window_bounds = array<i64: 1, 1536>}, {pipeline_mode = #tpu.pipeline_mode<synchronous>, transform_indices = @transform_3, window_bounds = array<i64: 1536, 384>}, {pipeline_mode = #tpu.pipeline_mode<synchronous>, transform_indices = @transform_4, window_bounds = array<i64: 1, 384>}, {transform_indices = @transform_5, window_bounds = array<i64: 8, 384>}]} {
    %c0 = arith.constant 0 : index
    %c0_0 = arith.constant 0 : index
    %0 = vector.load %arg2[%c0, %c0_0] : memref<8x384xf32, #tpu.memory_space<vmem>>, vector<8x384xf32>
    %1 = arith.truncf %0 : vector<8x384xf32> to vector<8x384xbf16>
    %c0_1 = arith.constant 0 : index
    %c0_2 = arith.constant 0 : index
    %2 = vector.load %arg3[%c0_1, %c0_2] : memref<384x1536xbf16, #tpu.memory_space<vmem>>, vector<384x1536xbf16>
    %cst = arith.constant dense<0.000000e+00> : vector<8x1536xf32>
    %3 = tpu.matmul %1, %2, %cst {dimension_numbers = #tpu.dot_dimension_numbers<[1], [0], [0], [1], [0, 0, 1, 1], [], []>} : vector<8x384xbf16>, vector<384x1536xbf16>, vector<8x1536xf32> -> vector<8x1536xf32>
    %c0_3 = arith.constant 0 : index
    %c0_4 = arith.constant 0 : index
    %4 = vector.load %arg4[%c0_3, %c0_4] : memref<1x1536xf32, #tpu.memory_space<vmem>>, vector<1x1536xf32>
    %5 = vector.broadcast %4 : vector<1x1536xf32> to vector<8x1536xf32>
    %6 = arith.addf %3, %5 : vector<8x1536xf32>
    %cst_5 = arith.constant 0.000000e+00 : f32
    %7 = vector.broadcast %cst_5 : f32 to vector<8x1536xf32>
    %8 = arith.maximumf %6, %7 : vector<8x1536xf32>
    %9 = arith.truncf %8 : vector<8x1536xf32> to vector<8x1536xbf16>
    %c0_6 = arith.constant 0 : index
    %c0_7 = arith.constant 0 : index
    %10 = vector.load %arg5[%c0_6, %c0_7] : memref<1536x384xbf16, #tpu.memory_space<vmem>>, vector<1536x384xbf16>
    %cst_8 = arith.constant dense<0.000000e+00> : vector<8x384xf32>
    %11 = tpu.matmul %9, %10, %cst_8 {dimension_numbers = #tpu.dot_dimension_numbers<[1], [0], [0], [1], [0, 0, 1, 1], [], []>} : vector<8x1536xbf16>, vector<1536x384xbf16>, vector<8x384xf32> -> vector<8x384xf32>
    %c0_9 = arith.constant 0 : index
    %c0_10 = arith.constant 0 : index
    %12 = vector.load %arg6[%c0_9, %c0_10] : memref<1x384xf32, #tpu.memory_space<vmem>>, vector<1x384xf32>
    %13 = vector.broadcast %12 : vector<1x384xf32> to vector<8x384xf32>
    %14 = arith.addf %11, %13 : vector<8x384xf32>
    %c0_11 = arith.constant 0 : index
    %c0_12 = arith.constant 0 : index
    %15 = vector.load %arg7[%c0_11, %c0_12] : memref<8x384xf32, #tpu.memory_space<vmem>>, vector<8x384xf32>
    tpu.vector_store %arg7[%c0_11, %c0_12], %14 {strides = array<i32>} : memref<8x384xf32, #tpu.memory_space<vmem>>, vector<8x384xf32>,
    return
  }
  func.func @transform_0(%arg0: i32, %arg1: i32) -> (i32, i32) {
    %c0_i32 = arith.constant 0 : i32
    %c0_i32_0 = arith.constant 0 : i32
    return %arg0, %c0_i32 : i32, i32
  }
  func.func @transform_1(%arg0: i32, %arg1: i32) -> (i32, i32) {
    %c0_i32 = arith.constant 0 : i32
    %c0_i32_0 = arith.constant 0 : i32
    %c0_i32_1 = arith.constant 0 : i32
    return %c0_i32, %c0_i32_0 : i32, i32
  }
  func.func @transform_2(%arg0: i32, %arg1: i32) -> (i32, i32) {
    %c0_i32 = arith.constant 0 : i32
    %c0_i32_0 = arith.constant 0 : i32
    %c0_i32_1 = arith.constant 0 : i32
    return %c0_i32, %c0_i32_0 : i32, i32
  }
  func.func @transform_3(%arg0: i32, %arg1: i32) -> (i32, i32) {
    %c0_i32 = arith.constant 0 : i32
    %c0_i32_0 = arith.constant 0 : i32
    %c0_i32_1 = arith.constant 0 : i32
    return %c0_i32, %c0_i32_0 : i32, i32
  }
  func.func @transform_4(%arg0: i32, %arg1: i32) -> (i32, i32) {
    %c0_i32 = arith.constant 0 : i32
    %c0_i32_0 = arith.constant 0 : i32
    %c0_i32_1 = arith.constant 0 : i32
    return %c0_i32, %c0_i32_0 : i32, i32
  }
  func.func @transform_5(%arg0: i32, %arg1: i32) -> (i32, i32) {
    %c0_i32 = arith.constant 0 : i32
    %c0_i32_0 = arith.constant 0 : i32
    return %arg0, %c0_i32 : i32, i32
  }
}

</mosaic_0001>

<bundles_post_ra>
// kernel: feed_forward.1
= control target key start
LH: loop header
LB: loop body
LE: loop exit
PB: predicated region body
PF: predicated region fallthrough
CT: control target
= control target key end

     0   :  { %s7336_s0 = inlined_call_operand.hbm [shape: f32[16,384], index: 0, kind: input, shape index: {}]   ;;  %s7337_s1 = inlined_call_operand.hbm [shape: bf16[384,1536], index: 1, kind: input, shape index: {}]   ;;  %s7338_s2 = inlined_call_operand.vmem [shape: f32[1,1536], index: 2, kind: input, shape index: {}]   ;;  %s7339_s3 = inlined_call_operand.hbm [shape: bf16[1536,384], index: 3, kind: input, shape index: {}]   ;;  %s7340_s4 = inlined_call_operand.vmem [shape: f32[1,384], index: 4, kind: input, shape index: {}]   ;;  %s7341_s5 = inlined_call_operand.hbm [shape: f32[16,384], index: 5, kind: output, shape index: {}]  }
   0x1   :  { %7345 = sst [smem:[#allocation12_spill]] %s7337_s1 }
   0x2   :  { %7346 = sst [smem:[#allocation13_spill]] %s7339_s3 }
   0x3   :  { %10 = vsyncpa [#allocation3], 0 }
   0x4   :  { %12 = vsyncpa [#allocation3 + $0x1], 0 }
   0x5   :  { %13 = vsyncpa [#allocation6], 0 }
   0x6   :  { %14 = vsyncpa [#allocation4], 0 }
   0x7   :  { %16 = vsyncpa [#allocation4 + $0x1], 0  ;;  %s6967_s18 = smov 0   ;;  %s6969_s19 = smov 0  }
   0x8   :  { %s6971_s20 = smov 0   ;;  %s6973_s21 = smov 0  }
   0x9   :  { %s6975_s22 = smov 0   ;;  %s6977_s23 = smov 0  }
   0xa LB: > { %s5132_s24 = sadd.s32 4294967295, %s6926_s23   ;;  %s5133_s25 = sadd.s32 4294967294, %s6926_s23   ;;  %s6926_s23 = sphi %s6977_s23, %s22_s23   ;;  %s6922_s22 = sphi %s6975_s22, %s7365_s22   ;;  %s6918_s21 = sphi %s6973_s21, %s7364_s21   ;;  %s6914_s20 = sphi %s6971_s20, %s7363_s20   ;;  %s6910_s19 = sphi %s6969_s19, %s7362_s19   ;;  %s6906_s18 = sphi %s6967_s18, %s7361_s18  }
   0xb   : > { %p54_p0 = scmp.ne.s32.totalorder %s6910_s19, %s6906_s18  ;;  %p7001_p1 = scmp.eq.s32.totalorder %s5132_s24, 0 }
   0xc   : > { %p7005_p2 = scmp.eq.s32.totalorder %s5132_s24, 1  ;;  %p168_p3 = scmp.eq.s32.totalorder %s5133_s25, 1 }
   0xd   : > { %s7347_s26 = scalar_select %p7001_p1, 1, 0 }
   0xe   : > { %p7011_p4 = por %p7001_p1, %p54_p0  ;;  %p5134_p5 = scmp.ge.s32.totalorder %s6926_s23, 1 }
   0xf   : > { %p7016_p6 = por %p168_p3, %p54_p0  ;;  %p175_p7 = scmp.lt.s32.totalorder %s6926_s23, 3 }
  0x10   : > { %s7349_s28 = scalar_select %p7011_p4, 1, 0 }
  0x11   : > { %s7350_s29 = scalar_select %p7016_p6, 1, 0 }
  0x12   : > { %p7021_p8 = pnand %p5134_p5, %p175_p7  ;;  %s6928_s6 = smov [#allocation5]  }
  0x13   : > { %s187_s7 = sshll.u32 %s6928_s6, 4  ;;  %s6929_s9 = smov [#allocation7]   ;;  %s188_s7 = int_to_ptr.vmem [resolvable:$true] %s187_s7 }
  0x14   : > { %p5869_p9 = pneg %p7021_p8  ;;  %s203_s10 = sshll.u32 %s6929_s9, 4  ;;  %s204_s10 = int_to_ptr.vmem [resolvable:$true] %s203_s10 }
  0x15   : > { %s6773_s11 = scalar_lea.vmem %s188_s7, 36864  ;;  %p6781_p5 = scmp.lt.s32.totalorder %s188_s7, %s188_s7 }
  0x16   : > { %p7030_p11 = pnand %p5869_p9, %p7001_p1  ;;  %p6774_p13 = scmp.ne.s32.totalorder %s188_s7, %s6773_s11 }
  0x17   : > { %p6782_p7 = scmp.lt.s32.totalorder %s6773_s11, %s6773_s11 }
  0x18   : > { %p6764_p12 = pneg %p7030_p11 }
  0x19   : > { %p6783_p10 = por %p6782_p7, %p6781_p5 }
  0x1a   : > { %p6776_p0 = pnand %p6774_p13, %p6764_p12 }
  0x1c   : > { %p6777_p3 = pneg %p6776_p0 }
  0x1e   : > { %p6784_p9 = pnand %p6783_p10, %p6777_p3 }
  0x20   : > { %6787 = shalt.err (!%p6784_p9)
}
  0x21   : > { %s6930_s12 = smov 768   ;;  %s6931_s13 = smov 48  }
  0x22   : > { %s7353_s1 = sld [smem:[#allocation12_spill]]  ;;  %s6799_s16 = scalar_lea.vmem %s204_s10, 36864 }
  0x23   : > { %p6800_p6 = scmp.ne.s32.totalorder %s204_s10, %s6799_s16  ;;  %p6807_p1 = scmp.lt.s32.totalorder %s204_s10, %s204_s10 }
  0x24   : > { %p6808_p4 = scmp.lt.s32.totalorder %s6799_s16, %s6799_s16 }
  0x25   : > { %p6802_p13 = pnand %p6800_p6, %p6764_p12 }
  0x26   : > { %p6809_p5 = por %p6808_p4, %p6807_p1 }
  0x27   : > { %p6803_p0 = pneg %p6802_p13 }
  0x28   : > { %5872 = dma.hbm_to_vmem [thread:$0]  (!%p7030_p11), %s7353_s1, 36864, %s188_s7, [#allocation6], %s6930_s12, %s6930_s12, %s6931_s13  }
  0x29   : > { %p6810_p10 = pnand %p6809_p5, %p6803_p0 }
  0x2b   : > { %6813 = shalt.err (!%p6810_p10)
}
  0x2c   : > { %s6932_s17 = smov 192   ;;  %s6933_s24 = smov 12  }
  0x2d   : > { %s7354_s3 = sld [smem:[#allocation13_spill]]  ;;  %s34_s7 = sadd.s32 1, %s6922_s22 }
  0x2e   : > { %s41_s9 = sadd.s32 1, %s6914_s20  ;;  %p36_p1 = scmp.ge.s32.totalorder %s34_s7, 2 }
  0x2f   : > { %p48_p4 = scmp.ne.s32.totalorder %s6914_s20, %s6910_s19  ;;  %p49_p6 = scmp.eq.s32.totalorder %s6926_s23, 0 }
  0x30   : > { %p5886_p12 = scmp.lt.s32.totalorder %s6926_s23, 2  ;;  %s7367_s7 = smov (%p36_p1, %s34_s7), 0 }
  0x31   : > { %p50_p3 = por %p49_p6, %p48_p4  ;;  %p7062_p7 = por %p7005_p2, %p48_p4 }
  0x32   : > { %s38_s8 = ssub.s32 %s6922_s22, %s7367_s7  ;;  %s220_s12 = sand.u32 1, %s6914_s20  }
  0x33   : > { %5875 = dma.hbm_to_vmem [thread:$0]  (!%p7030_p11), %s7354_s3, 36864, %s204_s10, [#allocation6], %s6932_s17, %s6932_s17, %s6933_s24  }
  0x34   : > { %p39_p9 = scmp.eq.s32.totalorder %s38_s8, 0  ;;  %s5853_s10 = smul.u32 24, %s220_s12 }
  0x35   : > { %p7069_p11 = pnand %p5886_p12, %p50_p3  ;;  %s5854_s15 = smul.u32 384, %s6922_s22 }
  0x36   : > { %s7074_s14 = scalar_select %p39_p9, %s6914_s20, %s41_s9  }
  0x37   : > { %s224_s16 = scalar_lea.vmem [#allocation2], %s5853_s10  ;;  %s230_s25 = scalar_lea.hbm %s7336_s0, %s5854_s15 }
  0x38   : > { %s232_s17 = sshll.u32 %s224_s16, 4  ;;  %s221_s6 = scalar_lea.sflag [#allocation3], %s220_s12  ;;  %s233_s17 = int_to_ptr.vmem [resolvable:$true] %s232_s17 }
  0x39   : > { %p6816_p2 = pneg %p7069_p11  ;;  %s6827_s8 = scalar_lea.vmem %s233_s17, 384 }
  0x3a   : > { %p6828_p13 = scmp.ne.s32.totalorder %s233_s17, %s6827_s8  ;;  %s6934_s1 = smov [#allocation2]  }
  0x3b   : > { %s6832_s3 = sshll.u32 %s6934_s1, 4  ;;  %s6833_s3 = int_to_ptr.vmem [resolvable:$false] %s6832_s3 }
  0x3c   : > { %p6830_p0 = pnand %p6828_p13, %p6816_p2  ;;  %s6834_s9 = scalar_lea.vmem %s6833_s3, 768 }
  0x3d   : > { %p6835_p10 = scmp.lt.s32.totalorder %s233_s17, %s6833_s3  ;;  %p6836_p1 = scmp.lt.s32.totalorder %s6834_s9, %s6827_s8 }
  0x3e   : > { %p6831_p5 = pneg %p6830_p0 }
  0x3f   : > { %p6837_p4 = por %p6836_p1, %p6835_p10 }
  0x41   : > { %p6838_p6 = pnand %p6837_p4, %p6831_p5 }
  0x43   : > { %6841 = shalt.err (!%p6838_p6)
}
  0x44   : > { %5879 = dma.hbm_to_vmem [thread:$0]  (!%p7069_p11), %s230_s25, 384, %s233_s17, %s221_s6  }
  0x45   : > { %241 = sbr.rel (%p7021_p8) target bundleno = 880 (0x370), region = 40  ;;  %s7087_s12 = sand.u32 (!%p7021_p8), 1, %s6910_s19  }
  0x46   : > { %s5855_s1 = smul.u32 (!%p7021_p8), 24, %s7087_s12  ;;  %s244_s10 = scalar_lea.sflag (!%p7021_p8), [#allocation3], %s7087_s12 }
  0x47   : > { %p7357_p12 = scmp.ne.s32.totalorder (!%p7021_p8), %s7349_s28, 0 }
  0x48   : > { %s7093_s3 = scalar_lea.vmem (!%p7021_p8), [#allocation2], %s5855_s1 }
  0x4a   : > { %6893 = dma.done.wait (%p7357_p12), %s244_s10, 384  }
  0x4b   : > { %6895 = vsyncadd (%p7357_p12), %s244_s10, 4294966912  ;;  %p7358_p3 = scmp.ne.s32.totalorder %s7347_s26, 0 }
  0x4d   : > { %6897 = dma.done.wait (%p7358_p3), [#allocation6], 73728  }
  0x4e   : > { %6899 = vsyncadd (%p7358_p3), [#allocation6], 4294893568  ;;  %v6935_v0 = vmov 0   ;;  %v5945_v1 = vld [vmem:[#allocation5 + $0x2a4] ss:$48 sps:$4 sm:$0xff]   ;;  %s7282_s27 = scalar_lea.vmem [#allocation8], %s5855_s1 }
  0x4f   : > { %2154 = vmatprep.mubr.bf16.mxu1 %v6935_v0  ;;  %v5947_v2 = vld [vmem:[#allocation5 + $0x8a4] ss:$48 sps:$4 sm:$0xff]   ;;  %2081 = vmatprep.subr.bf16.mxu0 %v5945_v1  ;;  %v5949_v3 = vld [vmem:[#allocation5 + $0x2a0] ss:$48 sps:$4 sm:$0xff]   ;;  %v5997_v35 = vld [vmem:[#allocation5 + $0x2ac] ss:$48 sps:$4 sm:$0xff]  }
  0x50   : > { %v5950_v4 = vld [vmem:[#allocation5 + $0x8a0] ss:$48 sps:$4 sm:$0xff]   ;;  %2122 = vmatprep.subr.bf16.mxu1 %v5947_v2  ;;  %v5951_v5 = vld [vmem:[#allocation5 + $0x244] ss:$48 sps:$4 sm:$0xff]   ;;  %2082 = vmatpush1.bf16.msra.mxu0 %v5949_v3  ;;  %v5995_v37 = vld [vmem:[#allocation5 + $0x2a8] ss:$48 sps:$4 sm:$0xff]  }
  0x51   : > { %2123 = vmatpush1.bf16.msra.mxu1 %v5950_v4  ;;  %v5953_v6 = vld [vmem:[#allocation5 + $0x844] ss:$48 sps:$4 sm:$0xff]   ;;  %v5955_v7 = vld [vmem:[#allocation5 + $0x240] ss:$48 sps:$4 sm:$0xff]   ;;  %2083 = vmatprep.subr.bf16.mxu0 %v5951_v5  ;;  %v6003_v40 = vld [vmem:[#allocation5 + $0x24c] ss:$48 sps:$4 sm:$0xff]  }
  0x52   : > { %v5956_v8 = vld [vmem:[#allocation5 + $0x840] ss:$48 sps:$4 sm:$0xff]   ;;  %2124 = vmatprep.subr.bf16.mxu1 %v5953_v6  ;;  %v5957_v9 = vld [vmem:[#allocation5 + $0x1e4] ss:$48 sps:$4 sm:$0xff]   ;;  %v6001_v41 = vld [vmem:[#allocation5 + $0x248] ss:$48 sps:$4 sm:$0xff]  }
  0x53   : > { %v5959_v10 = vld [vmem:[#allocation5 + $0x7e4] ss:$48 sps:$4 sm:$0xff]   ;;  %v5961_v11 = vld [vmem:[#allocation5 + $0x1e0] ss:$48 sps:$4 sm:$0xff]   ;;  %v6009_v44 = vld [vmem:[#allocation5 + $0x1ec] ss:$48 sps:$4 sm:$0xff]  }
  0x54   : > { %v5962_v12 = vld [vmem:[#allocation5 + $0x7e0] ss:$48 sps:$4 sm:$0xff]   ;;  %2084 = vmatpush1.bf16.msra.mxu0 %v5955_v7  ;;  %v5963_v13 = vld [vmem:[#allocation5 + $0x184] ss:$48 sps:$4 sm:$0xff]   ;;  %v6007_v45 = vld [vmem:[#allocation5 + $0x1e8] ss:$48 sps:$4 sm:$0xff]  }
  0x55   : > { %2125 = vmatpush1.bf16.msra.mxu1 %v5956_v8  ;;  %2085 = vmatprep.subr.bf16.mxu0 %v5957_v9  ;;  %v5965_v14 = vld [vmem:[#allocation5 + $0x784] ss:$48 sps:$4 sm:$0xff]   ;;  %v5967_v15 = vld [vmem:[#allocation5 + $0x180] ss:$48 sps:$4 sm:$0xff]   ;;  %v6015_v48 = vld [vmem:[#allocation5 + $0x18c] ss:$48 sps:$4 sm:$0xff]  }
  0x56   : > { %2126 = vmatprep.subr.bf16.mxu1 %v5959_v10  ;;  %v5968_v16 = vld [vmem:[#allocation5 + $0x780] ss:$48 sps:$4 sm:$0xff]   ;;  %v5969_v17 = vld [vmem:[#allocation5 + $0x124] ss:$48 sps:$4 sm:$0xff]   ;;  %v6013_v49 = vld [vmem:[#allocation5 + $0x188] ss:$48 sps:$4 sm:$0xff]  }
  0x57   : > { %v5971_v18 = vld [vmem:[#allocation5 + $0x724] ss:$48 sps:$4 sm:$0xff]   ;;  %v5973_v19 = vld [vmem:[#allocation5 + $0x120] ss:$48 sps:$4 sm:$0xff]   ;;  %v6021_v54 = vld [vmem:[#allocation5 + $0x12c] ss:$48 sps:$4 sm:$0xff]  }
  0x58   : > { %2086 = vmatpush1.bf16.msra.mxu0 %v5961_v11  ;;  %v5974_v20 = vld [vmem:[#allocation5 + $0x720] ss:$48 sps:$4 sm:$0xff]   ;;  %v5975_v21 = vld [vmem:[#allocation5 + $0xc4] ss:$48 sps:$4 sm:$0xff]   ;;  %v6019_v55 = vld [vmem:[#allocation5 + $0x128] ss:$48 sps:$4 sm:$0xff]  }
  0x59   : > { %2127 = vmatpush1.bf16.msra.mxu1 %v5962_v12  ;;  %2087 = vmatprep.subr.bf16.mxu0 %v5963_v13  ;;  %v5977_v22 = vld [vmem:[#allocation5 + $0x6c4] ss:$48 sps:$4 sm:$0xff]   ;;  %v5979_v23 = vld [vmem:[#allocation5 + $0xc0] ss:$48 sps:$4 sm:$0xff]   ;;  %v6027_v58 = vld [vmem:[#allocation5 + $0xcc] ss:$48 sps:$4 sm:$0xff]  }
  0x5a   : > { %2128 = vmatprep.subr.bf16.mxu1 %v5965_v14  ;;  %v5980_v24 = vld [vmem:[#allocation5 + $0x6c0] ss:$48 sps:$4 sm:$0xff]   ;;  %v5981_v25 = vld [vmem:[#allocation5 + $0x64] ss:$48 sps:$4 sm:$0xff]   ;;  %v6025_v59 = vld [vmem:[#allocation5 + $0xc8] ss:$48 sps:$4 sm:$0xff]  }
  0x5b   : > { %v5983_v26 = vld [vmem:[#allocation5 + $0x664] ss:$48 sps:$4 sm:$0xff]   ;;  %v5985_v27 = vld [vmem:[#allocation5 + $0x60] ss:$48 sps:$4 sm:$0xff]   ;;  %v6033_v62 = vld [vmem:[#allocation5 + $0x6c] ss:$48 sps:$4 sm:$0xff]  }
  0x5c   : > { %2088 = vmatpush1.bf16.msra.mxu0 %v5967_v15  ;;  %v5986_v28 = vld [vmem:[#allocation5 + $0x660] ss:$48 sps:$4 sm:$0xff]   ;;  %v5987_v29 = vld [vmem:[#allocation5 + $0x4] ss:$48 sps:$4 sm:$0xff]   ;;  %v6031_v63 = vld [vmem:[#allocation5 + $0x68] ss:$48 sps:$4 sm:$0xff]  }
  0x5d   : > { %2129 = vmatpush1.bf16.msra.mxu1 %v5968_v16  ;;  %2089 = vmatprep.subr.bf16.mxu0 %v5969_v17  ;;  %v5989_v30 = vld [vmem:[#allocation5 + $0x604] ss:$48 sps:$4 sm:$0xff]   ;;  %v5991_v31 = vld [vmem:[#allocation5] ss:$48 sps:$4 sm:$0xff]   ;;  %v6039_v3 = vld [vmem:[#allocation5 + $0xc] ss:$48 sps:$4 sm:$0xff]  }
  0x5e   : > { %2130 = vmatprep.subr.bf16.mxu1 %v5971_v18  ;;  %v5992_v32 = vld [vmem:[#allocation5 + $0x600] ss:$48 sps:$4 sm:$0xff]   ;;  %v5993_v34 = vld [vmem:[#allocation5 + $0x5a4] ss:$48 sps:$4 sm:$0xff]   ;;  %v6037_v4 = vld [vmem:[#allocation5 + $0x8] ss:$48 sps:$4 sm:$0xff]  }
  0x5f   : > { %v285_v33 = vld [vmem:[%s7093_s3 + $0x10] sm:$0xff]  ;;  %v284_v50 = vld [vmem:[%s7093_s3 + $0x8] sm:$0xff]  ;;  %v283_v6 = vld [vmem:[%s7093_s3] sm:$0xff]  ;;  %s5856_s25 = smul.u32 384, %s6918_s21  ;;  %s5038_s6 = sshll.u32 %s7282_s27, 4  ;;  %s5039_s6 = int_to_ptr.vmem [resolvable:$true] %s5038_s6 }
  0x60   : > { %2090 = vmatpush1.bf16.msra.mxu0 %v5973_v19  ;;  %v7105_v36 = vpack.c.bf16 %v285_v33, %v285_v33  ;;  %v5998_v38 = vld [vmem:[#allocation5 + $0x5a0] ss:$48 sps:$4 sm:$0xff]   ;;  %v5999_v39 = vld [vmem:[#allocation5 + $0x544] ss:$48 sps:$4 sm:$0xff]   ;;  %v7109_v53 = vpack.c.bf16 %v284_v50, %v284_v50  ;;  %v6043_v7 = vld [vmem:[#allocation5 + $0x5ac] ss:$48 sps:$4 sm:$0xff]   ;;  %v7114_v9 = vpack.c.bf16 %v283_v6, %v283_v6 }
  0x61   : > { %2131 = vmatpush1.bf16.msra.mxu1 %v5974_v20  ;;  %2091 = vmatprep.subr.bf16.mxu0 %v5975_v21  ;;  %v6004_v42 = vld [vmem:[#allocation5 + $0x540] ss:$48 sps:$4 sm:$0xff]   ;;  %v6005_v43 = vld [vmem:[#allocation5 + $0x4e4] ss:$48 sps:$4 sm:$0xff]   ;;  %v6046_v8 = vld [vmem:[#allocation5 + $0x8ac] ss:$48 sps:$4 sm:$0xff]   ;;  %s7293_s1 = scalar_lea.hbm %s7341_s5, %s5856_s25 }
  0x62   : > { %2132 = vmatprep.subr.bf16.mxu1 %v5977_v22  ;;  %v6010_v46 = vld [vmem:[#allocation5 + $0x4e0] ss:$48 sps:$4 sm:$0xff]   ;;  %v6011_v47 = vld [vmem:[#allocation5 + $0x484] ss:$48 sps:$4 sm:$0xff]   ;;  %2113 = vmatprep.mubr.bf16.mxu0 %v7109_v53  ;;  %v6041_v10 = vld [vmem:[#allocation5 + $0x5a8] ss:$48 sps:$4 sm:$0xff]  }
  0x63   : > { %v6016_v51 = vld [vmem:[#allocation5 + $0x480] ss:$48 sps:$4 sm:$0xff]   ;;  %v6017_v52 = vld [vmem:[#allocation5 + $0x424] ss:$48 sps:$4 sm:$0xff]   ;;  %v6044_v11 = vld [vmem:[#allocation5 + $0x8a8] ss:$48 sps:$4 sm:$0xff]  }
  0x64   : > { %2092 = vmatpush1.bf16.msra.mxu0 %v5979_v23  ;;  %v6022_v56 = vld [vmem:[#allocation5 + $0x420] ss:$48 sps:$4 sm:$0xff]   ;;  %v6023_v57 = vld [vmem:[#allocation5 + $0x3c4] ss:$48 sps:$4 sm:$0xff]   ;;  %v6049_v12 = vld [vmem:[#allocation5 + $0x54c] ss:$48 sps:$4 sm:$0xff]  }
  0x65   : > { %2133 = vmatpush1.bf16.msra.mxu1 %v5980_v24  ;;  %2093 = vmatprep.subr.bf16.mxu0 %v5981_v25  ;;  %v6028_v60 = vld [vmem:[#allocation5 + $0x3c0] ss:$48 sps:$4 sm:$0xff]   ;;  %v6029_v61 = vld [vmem:[#allocation5 + $0x364] ss:$48 sps:$4 sm:$0xff]   ;;  %v6052_v13 = vld [vmem:[#allocation5 + $0x84c] ss:$48 sps:$4 sm:$0xff]  }
  0x66   : > { %2134 = vmatprep.subr.bf16.mxu1 %v5983_v26  ;;  %v6034_v1 = vld [vmem:[#allocation5 + $0x360] ss:$48 sps:$4 sm:$0xff]   ;;  %v6035_v2 = vld [vmem:[#allocation5 + $0x304] ss:$48 sps:$4 sm:$0xff]   ;;  %v6047_v14 = vld [vmem:[#allocation5 + $0x548] ss:$48 sps:$4 sm:$0xff]  }
  0x67   : > { %v6040_v5 = vld [vmem:[#allocation5 + $0x300] ss:$48 sps:$4 sm:$0xff]   ;;  %v6050_v15 = vld [vmem:[#allocation5 + $0x848] ss:$48 sps:$4 sm:$0xff]   ;;  %v6055_v16 = vld [vmem:[#allocation5 + $0x4ec] ss:$48 sps:$4 sm:$0xff]  }
  0x68   : > { %2094 = vmatpush1.bf16.msra.mxu0 %v5985_v27  ;;  %v6058_v17 = vld [vmem:[#allocation5 + $0x7ec] ss:$48 sps:$4 sm:$0xff]   ;;  %v6053_v18 = vld [vmem:[#allocation5 + $0x4e8] ss:$48 sps:$4 sm:$0xff]   ;;  %v6106_v50 = vld [vmem:[#allocation5 + $0x7f4] ss:$48 sps:$4 sm:$0xff]  }
  0x69   : > { %2135 = vmatpush1.bf16.msra.mxu1 %v5986_v28  ;;  %2095 = vmatprep.subr.bf16.mxu0 %v5987_v29  ;;  %v6056_v19 = vld [vmem:[#allocation5 + $0x7e8] ss:$48 sps:$4 sm:$0xff]   ;;  %v6061_v20 = vld [vmem:[#allocation5 + $0x48c] ss:$48 sps:$4 sm:$0xff]   ;;  %v6128_v6 = vld [vmem:[#allocation5 + $0x670] ss:$48 sps:$4 sm:$0xff]  }
  0x6a   : > { %2136 = vmatprep.subr.bf16.mxu1 %v5989_v30  ;;  %v6064_v21 = vld [vmem:[#allocation5 + $0x78c] ss:$48 sps:$4 sm:$0xff]   ;;  %v6059_v22 = vld [vmem:[#allocation5 + $0x488] ss:$48 sps:$4 sm:$0xff]   ;;  %s5024_s10 = scalar_lea.sflag [#allocation4], %s7087_s12  ;;  %s6842_s3 = scalar_lea.vmem %s5039_s6, 384 }
  0x6b   : > { %v6062_v23 = vld [vmem:[#allocation5 + $0x788] ss:$48 sps:$4 sm:$0xff]   ;;  %v6067_v24 = vld [vmem:[#allocation5 + $0x42c] ss:$48 sps:$4 sm:$0xff]   ;;  %p6843_p8 = scmp.ne.s32.totalorder %s5039_s6, %s6842_s3  ;;  %s6936_s21 = smov [#allocation8]  }
  0x6c   : > { %2096 = vmatpush1.bf16.msra.mxu0 %v5991_v31  ;;  %v6070_v25 = vld [vmem:[#allocation5 + $0x72c] ss:$48 sps:$4 sm:$0xff]   ;;  %v6065_v26 = vld [vmem:[#allocation5 + $0x428] ss:$48 sps:$4 sm:$0xff]   ;;  %s6846_s26 = sshll.u32 %s6936_s21, 4  ;;  %s6847_s26 = int_to_ptr.vmem [resolvable:$false] %s6846_s26 }
  0x6d   : > { %2137 = vmatpush1.bf16.msra.mxu1 %v5992_v32  ;;  %2097 = vmatprep.subr.bf16.mxu0 %v5993_v34  ;;  %v6068_v27 = vld [vmem:[#allocation5 + $0x728] ss:$48 sps:$4 sm:$0xff]   ;;  %v6073_v28 = vld [vmem:[#allocation5 + $0x3cc] ss:$48 sps:$4 sm:$0xff]   ;;  %p6844_p9 = pnand %p6843_p8, %p7062_p7  ;;  %s6848_s28 = scalar_lea.vmem %s6847_s26, 768 }
  0x6e   : > { %2163 = vmatprep.subr.bf16.mxu1 %v5997_v35  ;;  %v6076_v29 = vld [vmem:[#allocation5 + $0x6cc] ss:$48 sps:$4 sm:$0xff]   ;;  %v6071_v30 = vld [vmem:[#allocation5 + $0x3c8] ss:$48 sps:$4 sm:$0xff]   ;;  %p6849_p2 = scmp.lt.s32.totalorder %s5039_s6, %s6847_s26  ;;  %p6850_p13 = scmp.lt.s32.totalorder %s6848_s28, %s6842_s3 }
  0x6f   : > { %v6074_v31 = vld [vmem:[#allocation5 + $0x6c8] ss:$48 sps:$4 sm:$0xff]   ;;  %v6079_v32 = vld [vmem:[#allocation5 + $0x36c] ss:$48 sps:$4 sm:$0xff]   ;;  %p6845_p11 = pneg %p6844_p9 }
  0x70   : > { %2155 = vmatmul.mubr.bf16.vlgmr.msra.gmra.mxu1 %v7105_v36  ;;  %2098 = vmatpush2.bf16.msra.mxu0 %v5998_v38  ;;  %v6082_v33 = vld [vmem:[#allocation5 + $0x66c] ss:$48 sps:$4 sm:$0xff]   ;;  %v6077_v34 = vld [vmem:[#allocation5 + $0x368] ss:$48 sps:$4 sm:$0xff]   ;;  %p6851_p0 = por %p6850_p13, %p6849_p2 }
  0x71   : > { %2164 = vmatpush1.bf16.msra.mxu1 %v5995_v37  ;;  %2099 = vmatprep.subr.bf16.mxu0 %v5999_v39  ;;  %v6080_v35 = vld [vmem:[#allocation5 + $0x668] ss:$48 sps:$4 sm:$0xff]   ;;  %v6085_v37 = vld [vmem:[#allocation5 + $0x30c] ss:$48 sps:$4 sm:$0xff]  }
  0x72   : > { %2165 = vmatprep.subr.bf16.mxu1 %v6003_v40  ;;  %2195 = vmatprep.mubr.bf16.mxu1 %v7109_v53  ;;  %v6088_v38 = vld [vmem:[#allocation5 + $0x60c] ss:$48 sps:$4 sm:$0xff]   ;;  %v6083_v39 = vld [vmem:[#allocation5 + $0x308] ss:$48 sps:$4 sm:$0xff]   ;;  %p6852_p5 = pnand %p6851_p0, %p6845_p11 }
  0x73   : > { %v6086_v40 = vld [vmem:[#allocation5 + $0x608] ss:$48 sps:$4 sm:$0xff]  }
  0x74   : > { %2100 = vmatpush2.bf16.msra.mxu0 %v6004_v42  ;;  %v6094_v42 = vld [vmem:[#allocation5 + $0x8b4] ss:$48 sps:$4 sm:$0xff]  }
  0x75   : > { %2166 = vmatpush1.bf16.msra.mxu1 %v6001_v41  ;;  %2101 = vmatprep.subr.bf16.mxu0 %v6005_v43  ;;  %v6091_v41 = vld [vmem:[#allocation5 + $0x2b4] ss:$48 sps:$4 sm:$0xff]   ;;  %v6089_v43 = vld [vmem:[#allocation5 + $0x2b0] ss:$48 sps:$4 sm:$0xff]  }
  0x76   : > { %2167 = vmatprep.subr.bf16.mxu1 %v6009_v44  ;;  %v6092_v44 = vld [vmem:[#allocation5 + $0x8b0] ss:$48 sps:$4 sm:$0xff]  }
  0x78   : > { %2102 = vmatpush2.bf16.msra.mxu0 %v6010_v46  ;;  %v6100_v46 = vld [vmem:[#allocation5 + $0x854] ss:$48 sps:$4 sm:$0xff]  }
  0x79   : > { %2168 = vmatpush1.bf16.msra.mxu1 %v6007_v45  ;;  %2103 = vmatprep.subr.bf16.mxu0 %v6011_v47  ;;  %v6097_v45 = vld [vmem:[#allocation5 + $0x254] ss:$48 sps:$4 sm:$0xff]   ;;  %v6095_v47 = vld [vmem:[#allocation5 + $0x250] ss:$48 sps:$4 sm:$0xff]  }
  0x7a   : > { %2169 = vmatprep.subr.bf16.mxu1 %v6015_v48  ;;  %v6098_v48 = vld [vmem:[#allocation5 + $0x850] ss:$48 sps:$4 sm:$0xff]  }
  0x7c   : > { %2104 = vmatpush2.bf16.msra.mxu0 %v6016_v51  ;;  %v6101_v51 = vld [vmem:[#allocation5 + $0x1f0] ss:$48 sps:$4 sm:$0xff]  }
  0x7d   : > { %2170 = vmatpush1.bf16.msra.mxu1 %v6013_v49  ;;  %2105 = vmatprep.subr.bf16.mxu0 %v6017_v52  ;;  %v6103_v49 = vld [vmem:[#allocation5 + $0x1f4] ss:$48 sps:$4 sm:$0xff]   ;;  %v6104_v52 = vld [vmem:[#allocation5 + $0x7f0] ss:$48 sps:$4 sm:$0xff]  }
  0x7e   : > { %2171 = vmatprep.subr.bf16.mxu1 %v6021_v54  ;;  %v6109_v54 = vld [vmem:[#allocation5 + $0x194] ss:$48 sps:$4 sm:$0xff]  }
  0x80   : > { %2106 = vmatpush2.bf16.msra.mxu0 %v6022_v56  ;;  %v6107_v56 = vld [vmem:[#allocation5 + $0x190] ss:$48 sps:$4 sm:$0xff]  }
  0x81   : > { %2172 = vmatpush1.bf16.msra.mxu1 %v6019_v55  ;;  %2107 = vmatprep.subr.bf16.mxu0 %v6023_v57  ;;  %v6112_v55 = vld [vmem:[#allocation5 + $0x794] ss:$48 sps:$4 sm:$0xff]   ;;  %v6110_v57 = vld [vmem:[#allocation5 + $0x790] ss:$48 sps:$4 sm:$0xff]  }
  0x82   : > { %2173 = vmatprep.subr.bf16.mxu1 %v6027_v58  ;;  %v6115_v58 = vld [vmem:[#allocation5 + $0x134] ss:$48 sps:$4 sm:$0xff]  }
  0x84   : > { %2108 = vmatpush2.bf16.msra.mxu0 %v6028_v60  ;;  %v6113_v60 = vld [vmem:[#allocation5 + $0x130] ss:$48 sps:$4 sm:$0xff]  }
  0x85   : > { %2174 = vmatpush1.bf16.msra.mxu1 %v6025_v59  ;;  %2109 = vmatprep.subr.bf16.mxu0 %v6029_v61  ;;  %v6118_v59 = vld [vmem:[#allocation5 + $0x734] ss:$48 sps:$4 sm:$0xff]   ;;  %v6116_v61 = vld [vmem:[#allocation5 + $0x730] ss:$48 sps:$4 sm:$0xff]  }
  0x86   : > { %2175 = vmatprep.subr.bf16.mxu1 %v6033_v62  ;;  %v6121_v62 = vld [vmem:[#allocation5 + $0xd4] ss:$48 sps:$4 sm:$0xff]  }
  0x88   : > { %2110 = vmatpush2.bf16.msra.mxu0 %v6034_v1  ;;  %v6119_v1 = vld [vmem:[#allocation5 + $0xd0] ss:$48 sps:$4 sm:$0xff]  }
  0x89   : > { %2176 = vmatpush1.bf16.msra.mxu1 %v6031_v63  ;;  %2111 = vmatprep.subr.bf16.mxu0 %v6035_v2  ;;  %v6124_v63 = vld [vmem:[#allocation5 + $0x6d4] ss:$48 sps:$4 sm:$0xff]   ;;  %v6122_v2 = vld [vmem:[#allocation5 + $0x6d0] ss:$48 sps:$4 sm:$0xff]  }
  0x8a   : > { %2177 = vmatprep.subr.bf16.mxu1 %v6039_v3  ;;  %v6127_v3 = vld [vmem:[#allocation5 + $0x74] ss:$48 sps:$4 sm:$0xff]  }
  0x8c   : > { %2112 = vmatpush2.bf16.msra.mxu0 %v6040_v5  ;;  %v6125_v5 = vld [vmem:[#allocation5 + $0x70] ss:$48 sps:$4 sm:$0xff]  }
  0x8d   : > { %2178 = vmatpush1.bf16.msra.mxu1 %v6037_v4  ;;  %2204 = vmatprep.subr.bf16.mxu0 %v6046_v8  ;;  %v6130_v4 = vld [vmem:[#allocation5 + $0x674] ss:$48 sps:$4 sm:$0xff]  }
  0x8e   : > { %2179 = vmatprep.subr.bf16.mxu1 %v6043_v7  ;;  %v6133_v7 = vld [vmem:[#allocation5 + $0x14] ss:$48 sps:$4 sm:$0xff]  }
  0x8f   : > { %2114 = vmatmul.mubr.bf16.vlgmr.msra.gmra.mxu0 %v7114_v9  ;;  %v6136_v8 = vld [vmem:[#allocation5 + $0x614] ss:$48 sps:$4 sm:$0xff]  }
  0x90   : > { %2205 = vmatpush1.bf16.msra.mxu0 %v6044_v11  ;;  %2236 = vmatprep.mubr.bf16.mxu0 %v6935_v0  ;;  %v6134_v11 = vld [vmem:[#allocation5 + $0x610] ss:$48 sps:$4 sm:$0xff]  }
  0x91   : > { %2180 = vmatpush2.bf16.msra.mxu1 %v6041_v10  ;;  %2206 = vmatprep.subr.bf16.mxu0 %v6052_v13  ;;  %v6131_v10 = vld [vmem:[#allocation5 + $0x10] ss:$48 sps:$4 sm:$0xff]   ;;  %v6142_v13 = vld [vmem:[#allocation5 + $0x2bc] ss:$48 sps:$4 sm:$0xff]  }
  0x92   : > { %2181 = vmatprep.subr.bf16.mxu1 %v6049_v12  ;;  %v6139_v12 = vld [vmem:[#allocation5 + $0x5b4] ss:$48 sps:$4 sm:$0xff]  }
  0x94   : > { %2207 = vmatpush1.bf16.msra.mxu0 %v6050_v15  ;;  %v6140_v15 = vld [vmem:[#allocation5 + $0x2b8] ss:$48 sps:$4 sm:$0xff]  }
  0x95   : > { %2182 = vmatpush2.bf16.msra.mxu1 %v6047_v14  ;;  %2208 = vmatprep.subr.bf16.mxu0 %v6058_v17  ;;  %v6137_v14 = vld [vmem:[#allocation5 + $0x5b0] ss:$48 sps:$4 sm:$0xff]   ;;  %v6148_v17 = vld [vmem:[#allocation5 + $0x25c] ss:$48 sps:$4 sm:$0xff]  }
  0x96   : > { %2183 = vmatprep.subr.bf16.mxu1 %v6055_v16  ;;  %v6145_v16 = vld [vmem:[#allocation5 + $0x554] ss:$48 sps:$4 sm:$0xff]  }
  0x98   : > { %2209 = vmatpush1.bf16.msra.mxu0 %v6056_v19  ;;  %v6146_v19 = vld [vmem:[#allocation5 + $0x258] ss:$48 sps:$4 sm:$0xff]  }
  0x99   : > { %2184 = vmatpush2.bf16.msra.mxu1 %v6053_v18  ;;  %2210 = vmatprep.subr.bf16.mxu0 %v6064_v21  ;;  %v6143_v18 = vld [vmem:[#allocation5 + $0x550] ss:$48 sps:$4 sm:$0xff]   ;;  %v6154_v21 = vld [vmem:[#allocation5 + $0x1fc] ss:$48 sps:$4 sm:$0xff]  }
  0x9a   : > { %2185 = vmatprep.subr.bf16.mxu1 %v6061_v20  ;;  %v6151_v20 = vld [vmem:[#allocation5 + $0x4f4] ss:$48 sps:$4 sm:$0xff]  }
  0x9c   : > { %2211 = vmatpush1.bf16.msra.mxu0 %v6062_v23  ;;  %v6152_v23 = vld [vmem:[#allocation5 + $0x1f8] ss:$48 sps:$4 sm:$0xff]  }
  0x9d   : > { %2186 = vmatpush2.bf16.msra.mxu1 %v6059_v22  ;;  %2212 = vmatprep.subr.bf16.mxu0 %v6070_v25  ;;  %v6149_v22 = vld [vmem:[#allocation5 + $0x4f0] ss:$48 sps:$4 sm:$0xff]   ;;  %v6160_v25 = vld [vmem:[#allocation5 + $0x19c] ss:$48 sps:$4 sm:$0xff]  }
  0x9e   : > { %2187 = vmatprep.subr.bf16.mxu1 %v6067_v24  ;;  %v6157_v24 = vld [vmem:[#allocation5 + $0x494] ss:$48 sps:$4 sm:$0xff]  }
  0xa0   : > { %2213 = vmatpush1.bf16.msra.mxu0 %v6068_v27  ;;  %v6158_v27 = vld [vmem:[#allocation5 + $0x198] ss:$48 sps:$4 sm:$0xff]  }
  0xa1   : > { %2188 = vmatpush2.bf16.msra.mxu1 %v6065_v26  ;;  %2214 = vmatprep.subr.bf16.mxu0 %v6076_v29  ;;  %v6155_v26 = vld [vmem:[#allocation5 + $0x490] ss:$48 sps:$4 sm:$0xff]   ;;  %v6166_v29 = vld [vmem:[#allocation5 + $0x13c] ss:$48 sps:$4 sm:$0xff]  }
  0xa2   : > { %2189 = vmatprep.subr.bf16.mxu1 %v6073_v28  ;;  %v6163_v28 = vld [vmem:[#allocation5 + $0x434] ss:$48 sps:$4 sm:$0xff]  }
  0xa4   : > { %2215 = vmatpush1.bf16.msra.mxu0 %v6074_v31  ;;  %v6164_v31 = vld [vmem:[#allocation5 + $0x138] ss:$48 sps:$4 sm:$0xff]  }
  0xa5   : > { %2190 = vmatpush2.bf16.msra.mxu1 %v6071_v30  ;;  %2216 = vmatprep.subr.bf16.mxu0 %v6082_v33  ;;  %v6161_v30 = vld [vmem:[#allocation5 + $0x430] ss:$48 sps:$4 sm:$0xff]   ;;  %v6172_v33 = vld [vmem:[#allocation5 + $0xdc] ss:$48 sps:$4 sm:$0xff]  }
  0xa6   : > { %2191 = vmatprep.subr.bf16.mxu1 %v6079_v32  ;;  %v6169_v32 = vld [vmem:[#allocation5 + $0x3d4] ss:$48 sps:$4 sm:$0xff]  }
  0xa8   : > { %2217 = vmatpush1.bf16.msra.mxu0 %v6080_v35  ;;  %v6170_v35 = vld [vmem:[#allocation5 + $0xd8] ss:$48 sps:$4 sm:$0xff]  }
  0xa9   : > { %2192 = vmatpush2.bf16.msra.mxu1 %v6077_v34  ;;  %2218 = vmatprep.subr.bf16.mxu0 %v6088_v38  ;;  %v6167_v34 = vld [vmem:[#allocation5 + $0x3d0] ss:$48 sps:$4 sm:$0xff]   ;;  %v6178_v38 = vld [vmem:[#allocation5 + $0x7c] ss:$48 sps:$4 sm:$0xff]  }
  0xaa   : > { %2193 = vmatprep.subr.bf16.mxu1 %v6085_v37  ;;  %v6175_v37 = vld [vmem:[#allocation5 + $0x374] ss:$48 sps:$4 sm:$0xff]  }
  0xac   : > { %2219 = vmatpush1.bf16.msra.mxu0 %v6086_v40  ;;  %v6176_v40 = vld [vmem:[#allocation5 + $0x78] ss:$48 sps:$4 sm:$0xff]  }
  0xad   : > { %2194 = vmatpush2.bf16.msra.mxu1 %v6083_v39  ;;  %2245 = vmatprep.subr.bf16.mxu0 %v6091_v41  ;;  %v6173_v39 = vld [vmem:[#allocation5 + $0x370] ss:$48 sps:$4 sm:$0xff]   ;;  %v6181_v41 = vld [vmem:[#allocation5 + $0x314] ss:$48 sps:$4 sm:$0xff]  }
  0xae   : > { %2286 = vmatprep.subr.bf16.mxu1 %v6094_v42  ;;  %v6184_v42 = vld [vmem:[#allocation5 + $0x1c] ss:$48 sps:$4 sm:$0xff]  }
  0xaf   : > { %2237 = vmatmul.mubr.bf16.vlgmr.msra.gmra.mxu0 %v7105_v36 }
  0xb0   : > { %2196 = vmatmul.mubr.bf16.vlgmr.msra.gmra.mxu1 %v7114_v9  ;;  %2246 = vmatpush1.bf16.msra.mxu0 %v6089_v43  ;;  %v6179_v43 = vld [vmem:[#allocation5 + $0x310] ss:$48 sps:$4 sm:$0xff]  }
  0xb1   : > { %2287 = vmatpush1.bf16.msra.mxu1 %v6092_v44  ;;  %2247 = vmatprep.subr.bf16.mxu0 %v6097_v45  ;;  %v6182_v44 = vld [vmem:[#allocation5 + $0x18] ss:$48 sps:$4 sm:$0xff]   ;;  %v6187_v45 = vld [vmem:[#allocation5 + $0x5bc] ss:$48 sps:$4 sm:$0xff]  }
  0xb2   : > { %2288 = vmatprep.subr.bf16.mxu1 %v6100_v46  ;;  %2318 = vmatprep.mubr.bf16.mxu1 %v6935_v0  ;;  %v6190_v46 = vld [vmem:[#allocation5 + $0x8bc] ss:$48 sps:$4 sm:$0xff]  }
  0xb3   : > { %2277 = vmatprep.mubr.bf16.mxu0 %v7109_v53 }
  0xb4   : > { %2248 = vmatpush1.bf16.msra.mxu0 %v6095_v47  ;;  %v6185_v47 = vld [vmem:[#allocation5 + $0x5b8] ss:$48 sps:$4 sm:$0xff]  }
  0xb5   : > { %2289 = vmatpush1.bf16.msra.mxu1 %v6098_v48  ;;  %2249 = vmatprep.subr.bf16.mxu0 %v6103_v49  ;;  %v6188_v48 = vld [vmem:[#allocation5 + $0x8b8] ss:$48 sps:$4 sm:$0xff]   ;;  %v6193_v49 = vld [vmem:[#allocation5 + $0x55c] ss:$48 sps:$4 sm:$0xff]  }
  0xb6   : > { %2290 = vmatprep.subr.bf16.mxu1 %v6106_v50  ;;  %v6196_v50 = vld [vmem:[#allocation5 + $0x85c] ss:$48 sps:$4 sm:$0xff]  }
  0xb8   : > { %2250 = vmatpush1.bf16.msra.mxu0 %v6101_v51  ;;  %v6191_v51 = vld [vmem:[#allocation5 + $0x558] ss:$48 sps:$4 sm:$0xff]  }
  0xb9   : > { %2291 = vmatpush1.bf16.msra.mxu1 %v6104_v52  ;;  %2251 = vmatprep.subr.bf16.mxu0 %v6109_v54  ;;  %v6194_v52 = vld [vmem:[#allocation5 + $0x858] ss:$48 sps:$4 sm:$0xff]   ;;  %v6199_v54 = vld [vmem:[#allocation5 + $0x4fc] ss:$48 sps:$4 sm:$0xff]  }
  0xba   : > { %2292 = vmatprep.subr.bf16.mxu1 %v6112_v55  ;;  %v6202_v55 = vld [vmem:[#allocation5 + $0x7fc] ss:$48 sps:$4 sm:$0xff]  }
  0xbc   : > { %2252 = vmatpush1.bf16.msra.mxu0 %v6107_v56  ;;  %v6197_v56 = vld [vmem:[#allocation5 + $0x4f8] ss:$48 sps:$4 sm:$0xff]  }
  0xbd   : > { %2293 = vmatpush1.bf16.msra.mxu1 %v6110_v57  ;;  %2253 = vmatprep.subr.bf16.mxu0 %v6115_v58  ;;  %v6200_v57 = vld [vmem:[#allocation5 + $0x7f8] ss:$48 sps:$4 sm:$0xff]   ;;  %v6205_v58 = vld [vmem:[#allocation5 + $0x49c] ss:$48 sps:$4 sm:$0xff]  }
  0xbe   : > { %2294 = vmatprep.subr.bf16.mxu1 %v6118_v59  ;;  %v6208_v59 = vld [vmem:[#allocation5 + $0x79c] ss:$48 sps:$4 sm:$0xff]  }
  0xc0   : > { %2254 = vmatpush1.bf16.msra.mxu0 %v6113_v60  ;;  %v6203_v60 = vld [vmem:[#allocation5 + $0x498] ss:$48 sps:$4 sm:$0xff]  }
  0xc1   : > { %2295 = vmatpush1.bf16.msra.mxu1 %v6116_v61  ;;  %2255 = vmatprep.subr.bf16.mxu0 %v6121_v62  ;;  %v6206_v61 = vld [vmem:[#allocation5 + $0x798] ss:$48 sps:$4 sm:$0xff]   ;;  %v6211_v62 = vld [vmem:[#allocation5 + $0x43c] ss:$48 sps:$4 sm:$0xff]  }
  0xc2   : > { %2296 = vmatprep.subr.bf16.mxu1 %v6124_v63  ;;  %v6214_v63 = vld [vmem:[#allocation5 + $0x73c] ss:$48 sps:$4 sm:$0xff]  }
  0xc4   : > { %2256 = vmatpush1.bf16.msra.mxu0 %v6119_v1  ;;  %v6209_v1 = vld [vmem:[#allocation5 + $0x438] ss:$48 sps:$4 sm:$0xff]  }
  0xc5   : > { %2297 = vmatpush1.bf16.msra.mxu1 %v6122_v2  ;;  %2257 = vmatprep.subr.bf16.mxu0 %v6127_v3  ;;  %v6212_v2 = vld [vmem:[#allocation5 + $0x738] ss:$48 sps:$4 sm:$0xff]   ;;  %v6217_v3 = vld [vmem:[#allocation5 + $0x3dc] ss:$48 sps:$4 sm:$0xff]  }
  0xc6   : > { %2298 = vmatprep.subr.bf16.mxu1 %v6130_v4  ;;  %v6220_v4 = vld [vmem:[#allocation5 + $0x6dc] ss:$48 sps:$4 sm:$0xff]  }
  0xc8   : > { %2258 = vmatpush1.bf16.msra.mxu0 %v6125_v5  ;;  %v6215_v5 = vld [vmem:[#allocation5 + $0x3d8] ss:$48 sps:$4 sm:$0xff]  }
  0xc9   : > { %2299 = vmatpush1.bf16.msra.mxu1 %v6128_v6  ;;  %2259 = vmatprep.subr.bf16.mxu0 %v6133_v7  ;;  %v6218_v6 = vld [vmem:[#allocation5 + $0x6d8] ss:$48 sps:$4 sm:$0xff]   ;;  %v6223_v7 = vld [vmem:[#allocation5 + $0x37c] ss:$48 sps:$4 sm:$0xff]  }
  0xca   : > { %2300 = vmatprep.subr.bf16.mxu1 %v6136_v8  ;;  %v6226_v8 = vld [vmem:[#allocation5 + $0x67c] ss:$48 sps:$4 sm:$0xff]  }
  0xcc   : > { %2260 = vmatpush1.bf16.msra.mxu0 %v6131_v10  ;;  %v6221_v10 = vld [vmem:[#allocation5 + $0x378] ss:$48 sps:$4 sm:$0xff]  }
  0xcd   : > { %2301 = vmatpush1.bf16.msra.mxu1 %v6134_v11  ;;  %2261 = vmatprep.subr.bf16.mxu0 %v6139_v12  ;;  %v6224_v11 = vld [vmem:[#allocation5 + $0x678] ss:$48 sps:$4 sm:$0xff]   ;;  %v6229_v12 = vld [vmem:[#allocation5 + $0x31c] ss:$48 sps:$4 sm:$0xff]  }
  0xce   : > { %2327 = vmatprep.subr.bf16.mxu1 %v6142_v13  ;;  %v6232_v13 = vld [vmem:[#allocation5 + $0x61c] ss:$48 sps:$4 sm:$0xff]  }
  0xd0   : > { %2319 = vmatmul.mubr.bf16.vlgmr.msra.gmra.mxu1 %v7105_v36  ;;  %2262 = vmatpush2.bf16.msra.mxu0 %v6137_v14  ;;  %v6227_v14 = vld [vmem:[#allocation5 + $0x318] ss:$48 sps:$4 sm:$0xff]  }
  0xd1   : > { %2328 = vmatpush1.bf16.msra.mxu1 %v6140_v15  ;;  %2263 = vmatprep.subr.bf16.mxu0 %v6145_v16  ;;  %v6230_v15 = vld [vmem:[#allocation5 + $0x618] ss:$48 sps:$4 sm:$0xff]   ;;  %v6235_v16 = vld [vmem:[#allocation5 + $0x2c4] ss:$48 sps:$4 sm:$0xff]  }
  0xd2   : > { %2329 = vmatprep.subr.bf16.mxu1 %v6148_v17  ;;  %2359 = vmatprep.mubr.bf16.mxu1 %v7109_v53  ;;  %v6238_v17 = vld [vmem:[#allocation5 + $0x8c4] ss:$48 sps:$4 sm:$0xff]  }
  0xd4   : > { %2264 = vmatpush2.bf16.msra.mxu0 %v6143_v18  ;;  %v6233_v18 = vld [vmem:[#allocation5 + $0x2c0] ss:$48 sps:$4 sm:$0xff]  }
  0xd5   : > { %2330 = vmatpush1.bf16.msra.mxu1 %v6146_v19  ;;  %2265 = vmatprep.subr.bf16.mxu0 %v6151_v20  ;;  %v6236_v19 = vld [vmem:[#allocation5 + $0x8c0] ss:$48 sps:$4 sm:$0xff]   ;;  %v6241_v20 = vld [vmem:[#allocation5 + $0x264] ss:$48 sps:$4 sm:$0xff]  }
  0xd6   : > { %2331 = vmatprep.subr.bf16.mxu1 %v6154_v21  ;;  %v6244_v21 = vld [vmem:[#allocation5 + $0x864] ss:$48 sps:$4 sm:$0xff]  }
  0xd8   : > { %2266 = vmatpush2.bf16.msra.mxu0 %v6149_v22  ;;  %v6239_v22 = vld [vmem:[#allocation5 + $0x260] ss:$48 sps:$4 sm:$0xff]  }
  0xd9   : > { %2332 = vmatpush1.bf16.msra.mxu1 %v6152_v23  ;;  %2267 = vmatprep.subr.bf16.mxu0 %v6157_v24  ;;  %v6242_v23 = vld [vmem:[#allocation5 + $0x860] ss:$48 sps:$4 sm:$0xff]   ;;  %v6247_v24 = vld [vmem:[#allocation5 + $0x204] ss:$48 sps:$4 sm:$0xff]  }
  0xda   : > { %2333 = vmatprep.subr.bf16.mxu1 %v6160_v25  ;;  %v6250_v25 = vld [vmem:[#allocation5 + $0x804] ss:$48 sps:$4 sm:$0xff]  }
  0xdc   : > { %2268 = vmatpush2.bf16.msra.mxu0 %v6155_v26  ;;  %v6245_v26 = vld [vmem:[#allocation5 + $0x200] ss:$48 sps:$4 sm:$0xff]  }
  0xdd   : > { %2334 = vmatpush1.bf16.msra.mxu1 %v6158_v27  ;;  %2269 = vmatprep.subr.bf16.mxu0 %v6163_v28  ;;  %v6248_v27 = vld [vmem:[#allocation5 + $0x800] ss:$48 sps:$4 sm:$0xff]   ;;  %v6253_v28 = vld [vmem:[#allocation5 + $0x1a4] ss:$48 sps:$4 sm:$0xff]  }
  0xde   : > { %2335 = vmatprep.subr.bf16.mxu1 %v6166_v29  ;;  %v6256_v29 = vld [vmem:[#allocation5 + $0x7a4] ss:$48 sps:$4 sm:$0xff]  }
  0xe0   : > { %2270 = vmatpush2.bf16.msra.mxu0 %v6161_v30  ;;  %v6251_v30 = vld [vmem:[#allocation5 + $0x1a0] ss:$48 sps:$4 sm:$0xff]  }
  0xe1   : > { %2336 = vmatpush1.bf16.msra.mxu1 %v6164_v31  ;;  %2271 = vmatprep.subr.bf16.mxu0 %v6169_v32  ;;  %v6254_v31 = vld [vmem:[#allocation5 + $0x7a0] ss:$48 sps:$4 sm:$0xff]   ;;  %v6259_v32 = vld [vmem:[#allocation5 + $0x144] ss:$48 sps:$4 sm:$0xff]  }
  0xe2   : > { %2337 = vmatprep.subr.bf16.mxu1 %v6172_v33  ;;  %v6262_v33 = vld [vmem:[#allocation5 + $0x744] ss:$48 sps:$4 sm:$0xff]  }
  0xe4   : > { %2272 = vmatpush2.bf16.msra.mxu0 %v6167_v34  ;;  %v6257_v34 = vld [vmem:[#allocation5 + $0x140] ss:$48 sps:$4 sm:$0xff]  }
  0xe5   : > { %2338 = vmatpush1.bf16.msra.mxu1 %v6170_v35  ;;  %2273 = vmatprep.subr.bf16.mxu0 %v6175_v37  ;;  %v6260_v35 = vld [vmem:[#allocation5 + $0x740] ss:$48 sps:$4 sm:$0xff]   ;;  %v6265_v37 = vld [vmem:[#allocation5 + $0xe4] ss:$48 sps:$4 sm:$0xff]  }
  0xe6   : > { %2339 = vmatprep.subr.bf16.mxu1 %v6178_v38  ;;  %v6268_v38 = vld [vmem:[#allocation5 + $0x6e4] ss:$48 sps:$4 sm:$0xff]  }
  0xe8   : > { %2274 = vmatpush2.bf16.msra.mxu0 %v6173_v39  ;;  %v6263_v39 = vld [vmem:[#allocation5 + $0xe0] ss:$48 sps:$4 sm:$0xff]  }
  0xe9   : > { %2340 = vmatpush1.bf16.msra.mxu1 %v6176_v40  ;;  %2275 = vmatprep.subr.bf16.mxu0 %v6181_v41  ;;  %v6266_v40 = vld [vmem:[#allocation5 + $0x6e0] ss:$48 sps:$4 sm:$0xff]   ;;  %v6271_v41 = vld [vmem:[#allocation5 + $0x84] ss:$48 sps:$4 sm:$0xff]  }
  0xea   : > { %2341 = vmatprep.subr.bf16.mxu1 %v6184_v42  ;;  %v6274_v42 = vld [vmem:[#allocation5 + $0x684] ss:$48 sps:$4 sm:$0xff]  }
  0xec   : > { %2276 = vmatpush2.bf16.msra.mxu0 %v6179_v43  ;;  %v6269_v43 = vld [vmem:[#allocation5 + $0x80] ss:$48 sps:$4 sm:$0xff]  }
  0xed   : > { %2342 = vmatpush1.bf16.msra.mxu1 %v6182_v44  ;;  %2368 = vmatprep.subr.bf16.mxu0 %v6190_v46  ;;  %v6272_v44 = vld [vmem:[#allocation5 + $0x680] ss:$48 sps:$4 sm:$0xff]   ;;  %v6280_v46 = vld [vmem:[#allocation5 + $0x624] ss:$48 sps:$4 sm:$0xff]  }
  0xee   : > { %2343 = vmatprep.subr.bf16.mxu1 %v6187_v45  ;;  %v6277_v45 = vld [vmem:[#allocation5 + $0x24] ss:$48 sps:$4 sm:$0xff]  }
  0xef   : > { %2278 = vmatmul.mubr.bf16.vlgmr.msra.gmra.mxu0 %v7114_v9 }
  0xf0   : > { %2369 = vmatpush1.bf16.msra.mxu0 %v6188_v48  ;;  %2400 = vmatprep.mubr.bf16.mxu0 %v6935_v0  ;;  %v6278_v48 = vld [vmem:[#allocation5 + $0x620] ss:$48 sps:$4 sm:$0xff]  }
  0xf1   : > { %2344 = vmatpush2.bf16.msra.mxu1 %v6185_v47  ;;  %2370 = vmatprep.subr.bf16.mxu0 %v6196_v50  ;;  %v6275_v47 = vld [vmem:[#allocation5 + $0x20] ss:$48 sps:$4 sm:$0xff]   ;;  %v6286_v50 = vld [vmem:[#allocation5 + $0x2cc] ss:$48 sps:$4 sm:$0xff]  }
  0xf2   : > { %2345 = vmatprep.subr.bf16.mxu1 %v6193_v49  ;;  %v6283_v49 = vld [vmem:[#allocation5 + $0x5c4] ss:$48 sps:$4 sm:$0xff]  }
  0xf4   : > { %2371 = vmatpush1.bf16.msra.mxu0 %v6194_v52  ;;  %v6284_v52 = vld [vmem:[#allocation5 + $0x2c8] ss:$48 sps:$4 sm:$0xff]  }
  0xf5   : > { %2346 = vmatpush2.bf16.msra.mxu1 %v6191_v51  ;;  %2372 = vmatprep.subr.bf16.mxu0 %v6202_v55  ;;  %v6281_v51 = vld [vmem:[#allocation5 + $0x5c0] ss:$48 sps:$4 sm:$0xff]   ;;  %v6292_v55 = vld [vmem:[#allocation5 + $0x26c] ss:$48 sps:$4 sm:$0xff]  }
  0xf6   : > { %2347 = vmatprep.subr.bf16.mxu1 %v6199_v54  ;;  %v6289_v54 = vld [vmem:[#allocation5 + $0x564] ss:$48 sps:$4 sm:$0xff]  }
  0xf8   : > { %2373 = vmatpush1.bf16.msra.mxu0 %v6200_v57  ;;  %v6287_v57 = vld [vmem:[#allocation5 + $0x560] ss:$48 sps:$4 sm:$0xff]  }
  0xf9   : > { %2348 = vmatpush2.bf16.msra.mxu1 %v6197_v56  ;;  %2374 = vmatprep.subr.bf16.mxu0 %v6208_v59  ;;  %v6295_v59 = vld [vmem:[#allocation5 + $0x504] ss:$48 sps:$4 sm:$0xff]  }
  0xfa   : > { %2349 = vmatprep.subr.bf16.mxu1 %v6205_v58  ;;  %v6290_v58 = vld [vmem:[#allocation5 + $0x268] ss:$48 sps:$4 sm:$0xff]  }
  0xfc   : > { %2375 = vmatpush1.bf16.msra.mxu0 %v6206_v61  ;;  %v6298_v61 = vld [vmem:[#allocation5 + $0x20c] ss:$48 sps:$4 sm:$0xff]  }
  0xfd   : > { %2350 = vmatpush2.bf16.msra.mxu1 %v6203_v60  ;;  %2376 = vmatprep.subr.bf16.mxu0 %v6214_v63  ;;  %v6293_v63 = vld [vmem:[#allocation5 + $0x500] ss:$48 sps:$4 sm:$0xff]  }
  0xfe   : > { %2351 = vmatprep.subr.bf16.mxu1 %v6211_v62 }
 0x100   : > { %2377 = vmatpush1.bf16.msra.mxu0 %v6212_v2  ;;  %v6301_v2 = vld [vmem:[#allocation5 + $0x4a4] ss:$48 sps:$4 sm:$0xff]  }
 0x101   : > { %2352 = vmatpush2.bf16.msra.mxu1 %v6209_v1  ;;  %2378 = vmatprep.subr.bf16.mxu0 %v6220_v4  ;;  %v6296_v1 = vld [vmem:[#allocation5 + $0x208] ss:$48 sps:$4 sm:$0xff]   ;;  %v6304_v4 = vld [vmem:[#allocation5 + $0x1ac] ss:$48 sps:$4 sm:$0xff]  }
 0x102   : > { %2353 = vmatprep.subr.bf16.mxu1 %v6217_v3 }
 0x104   : > { %2379 = vmatpush1.bf16.msra.mxu0 %v6218_v6  ;;  %v6302_v6 = vld [vmem:[#allocation5 + $0x1a8] ss:$48 sps:$4 sm:$0xff]  }
 0x105   : > { %2354 = vmatpush2.bf16.msra.mxu1 %v6215_v5  ;;  %2380 = vmatprep.subr.bf16.mxu0 %v6226_v8  ;;  %v6299_v5 = vld [vmem:[#allocation5 + $0x4a0] ss:$48 sps:$4 sm:$0xff]   ;;  %v6310_v8 = vld [vmem:[#allocation5 + $0x14c] ss:$48 sps:$4 sm:$0xff]  }
 0x106   : > { %2355 = vmatprep.subr.bf16.mxu1 %v6223_v7  ;;  %v6307_v7 = vld [vmem:[#allocation5 + $0x444] ss:$48 sps:$4 sm:$0xff]  }
 0x108   : > { %2381 = vmatpush1.bf16.msra.mxu0 %v6224_v11  ;;  %v6313_v11 = vld [vmem:[#allocation5 + $0x3e4] ss:$48 sps:$4 sm:$0xff]  }
 0x109   : > { %2356 = vmatpush2.bf16.msra.mxu1 %v6221_v10  ;;  %2382 = vmatprep.subr.bf16.mxu0 %v6232_v13  ;;  %v6305_v10 = vld [vmem:[#allocation5 + $0x440] ss:$48 sps:$4 sm:$0xff]  }
 0x10a   : > { %2357 = vmatprep.subr.bf16.mxu1 %v6229_v12  ;;  %v6316_v12 = vld [vmem:[#allocation5 + $0xec] ss:$48 sps:$4 sm:$0xff]   ;;  %v6311_v13 = vld [vmem:[#allocation5 + $0x3e0] ss:$48 sps:$4 sm:$0xff]  }
 0x10c   : > { %2383 = vmatpush1.bf16.msra.mxu0 %v6230_v15  ;;  %v6319_v15 = vld [vmem:[#allocation5 + $0x384] ss:$48 sps:$4 sm:$0xff]  }
 0x10d   : > { %2358 = vmatpush2.bf16.msra.mxu1 %v6227_v14  ;;  %2409 = vmatprep.subr.bf16.mxu0 %v6235_v16  ;;  %v6314_v14 = vld [vmem:[#allocation5 + $0xe8] ss:$48 sps:$4 sm:$0xff]   ;;  %v581_v16 = vlaneseq }
 0x10e   : > { %2450 = vmatprep.subr.bf16.mxu1 %v6238_v17  ;;  %v6322_v17 = vld [vmem:[#allocation5 + $0x8c] ss:$48 sps:$4 sm:$0xff]  }
 0x10f   : > { %2401 = vmatmul.mubr.bf16.vlgmr.msra.gmra.mxu0 %v7105_v36 }
 0x110   : > { %2360 = vmatmul.mubr.bf16.vlgmr.msra.gmra.mxu1 %v7114_v9  ;;  %2410 = vmatpush1.bf16.msra.mxu0 %v6233_v18  ;;  %v6317_v18 = vld [vmem:[#allocation5 + $0x380] ss:$48 sps:$4 sm:$0xff]  }
 0x111   : > { %2451 = vmatpush1.bf16.msra.mxu1 %v6236_v19  ;;  %2411 = vmatprep.subr.bf16.mxu0 %v6241_v20  ;;  %v6320_v19 = vld [vmem:[#allocation5 + $0x88] ss:$48 sps:$4 sm:$0xff]   ;;  %v6325_v20 = vld [vmem:[#allocation5 + $0x324] ss:$48 sps:$4 sm:$0xff]  }
 0x112   : > { %2452 = vmatprep.subr.bf16.mxu1 %v6244_v21  ;;  %2482 = vmatprep.mubr.bf16.mxu1 %v6935_v0  ;;  %v7136_v21 = vshrl.u32 %v581_v16, 7 }
 0x113   : > { %2441 = vmatprep.mubr.bf16.mxu0 %v7109_v53 }
 0x114   : > { %2412 = vmatpush1.bf16.msra.mxu0 %v6239_v22  ;;  %v6328_v22 = vld [vmem:[#allocation5 + $0x2c] ss:$48 sps:$4 sm:$0xff]  }
 0x115   : > { %2453 = vmatpush1.bf16.msra.mxu1 %v6242_v23  ;;  %2413 = vmatprep.subr.bf16.mxu0 %v6247_v24  ;;  %v6323_v23 = vld [vmem:[#allocation5 + $0x320] ss:$48 sps:$4 sm:$0xff]   ;;  %v6326_v24 = vld [vmem:[#allocation5 + $0x28] ss:$48 sps:$4 sm:$0xff]  }
 0x116   : > { %2454 = vmatprep.subr.bf16.mxu1 %v6250_v25  ;;  %v7141_v25 = vld [vmem:[%s7338_s2] sm:$0xff] }
 0x118   : > { %2414 = vmatpush1.bf16.msra.mxu0 %v6245_v26  ;;  %v7144_v26 = vsub.s32 0, %v7136_v21 }
 0x119   : > { %2455 = vmatpush1.bf16.msra.mxu1 %v6248_v27  ;;  %2415 = vmatprep.subr.bf16.mxu0 %v6253_v28  ;;  %v6331_v27 = vld [vmem:[#allocation5 + $0x5cc] ss:$48 sps:$4 sm:$0xff]  }
 0x11a   : > { %2456 = vmatprep.subr.bf16.mxu1 %v6256_v29  ;;  %v6334_v28 = vld [vmem:[#allocation5 + $0x8cc] ss:$48 sps:$4 sm:$0xff]   ;;  %v6329_v29 = vld [vmem:[#allocation5 + $0x5c8] ss:$48 sps:$4 sm:$0xff]  }
 0x11c   : > { %2416 = vmatpush1.bf16.msra.mxu0 %v6251_v30  ;;  %v6332_v30 = vld [vmem:[#allocation5 + $0x8c8] ss:$48 sps:$4 sm:$0xff]  }
 0x11d   : > { %2457 = vmatpush1.bf16.msra.mxu1 %v6254_v31  ;;  %2417 = vmatprep.subr.bf16.mxu0 %v6259_v32  ;;  %v584_v31 = vrot.slane %v7141_v25, %v7144_v26  ;;  %v6337_v32 = vld [vmem:[#allocation5 + $0x56c] ss:$48 sps:$4 sm:$0xff]  }
 0x11e   : > { %2458 = vmatprep.subr.bf16.mxu1 %v6262_v33  ;;  %v6340_v33 = vld [vmem:[#allocation5 + $0x86c] ss:$48 sps:$4 sm:$0xff]  }
 0x120   : > { %2418 = vmatpush1.bf16.msra.mxu0 %v6257_v34  ;;  %v6335_v34 = vld [vmem:[#allocation5 + $0x568] ss:$48 sps:$4 sm:$0xff]  }
 0x121   : > { %2459 = vmatpush1.bf16.msra.mxu1 %v6260_v35  ;;  %2419 = vmatprep.subr.bf16.mxu0 %v6265_v37  ;;  %v6338_v37 = vld [vmem:[#allocation5 + $0x868] ss:$48 sps:$4 sm:$0xff]  }
 0x122   : > { %2460 = vmatprep.subr.bf16.mxu1 %v6268_v38  ;;  %v6343_v38 = vld [vmem:[#allocation5 + $0x50c] ss:$48 sps:$4 sm:$0xff]  }
 0x124   : > { %2420 = vmatpush1.bf16.msra.mxu0 %v6263_v39  ;;  %v6346_v39 = vld [vmem:[#allocation5 + $0x80c] ss:$48 sps:$4 sm:$0xff]  }
 0x125   : > { %2461 = vmatpush1.bf16.msra.mxu1 %v6266_v40  ;;  %2421 = vmatprep.subr.bf16.mxu0 %v6271_v41 }
 0x126   : > { %2462 = vmatprep.subr.bf16.mxu1 %v6274_v42 }
 0x128   : > { %2422 = vmatpush1.bf16.msra.mxu0 %v6269_v43  ;;  %v6341_v43 = vld [vmem:[#allocation5 + $0x508] ss:$48 sps:$4 sm:$0xff]  }
 0x129   : > { %2463 = vmatpush1.bf16.msra.mxu1 %v6272_v44  ;;  %2423 = vmatprep.subr.bf16.mxu0 %v6277_v45  ;;  %v6344_v44 = vld [vmem:[#allocation5 + $0x808] ss:$48 sps:$4 sm:$0xff]  }
 0x12a   : > { %2464 = vmatprep.subr.bf16.mxu1 %v6280_v46  ;;  %v6349_v46 = vld [vmem:[#allocation5 + $0x4ac] ss:$48 sps:$4 sm:$0xff]  }
 0x12c   : > { %2424 = vmatpush1.bf16.msra.mxu0 %v6275_v47  ;;  %v6352_v47 = vld [vmem:[#allocation5 + $0x7ac] ss:$48 sps:$4 sm:$0xff]  }
 0x12d   : > { %2465 = vmatpush1.bf16.msra.mxu1 %v6278_v48  ;;  %2425 = vmatprep.subr.bf16.mxu0 %v6283_v49  ;;  %v6347_v49 = vld [vmem:[#allocation5 + $0x4a8] ss:$48 sps:$4 sm:$0xff]  }
 0x12e   : > { %2491 = vmatprep.subr.bf16.mxu1 %v6286_v50  ;;  %v6350_v50 = vld [vmem:[#allocation5 + $0x7a8] ss:$48 sps:$4 sm:$0xff]  }
 0x130   : > { %v7130_v56 = vpop.f32.mrf.mxu1  ;;  %2483 = vmatmul.mubr.bf16.vlgmr.msra.gmra.mxu1 %v7105_v36  ;;  %2426 = vmatpush2.bf16.msra.mxu0 %v6281_v51  ;;  %v6355_v51 = vld [vmem:[#allocation5 + $0x44c] ss:$48 sps:$4 sm:$0xff]  }
 0x131   : > { %2492 = vmatpush1.bf16.msra.mxu1 %v6284_v52  ;;  %2427 = vmatprep.subr.bf16.mxu0 %v6289_v54  ;;  %v6358_v52 = vld [vmem:[#allocation5 + $0x74c] ss:$48 sps:$4 sm:$0xff]   ;;  %v7154_v54 = vsub.s32 1, %v7136_v21 }
 0x132   : > { %v7133_v60 = vpop.f32.mrf.mxu1  ;;  %2493 = vmatprep.subr.bf16.mxu1 %v6292_v55  ;;  %2523 = vmatprep.mubr.bf16.mxu1 %v7109_v53  ;;  %v6308_v53 = vld [vmem:[#allocation5 + $0x148] ss:$48 sps:$4 sm:$0xff]  }
 0x133   : > { %v6356_v55 = vld [vmem:[#allocation5 + $0x748] ss:$48 sps:$4 sm:$0xff]  }
 0x134   : > { %v2160_v62 = vpop.f32.mrf.mxu1  ;;  %2428 = vmatpush2.bf16.msra.mxu0 %v6287_v57  ;;  %v6364_v57 = vld [vmem:[#allocation5 + $0x6ec] ss:$48 sps:$4 sm:$0xff]  }
 0x135   : > { %2494 = vmatpush1.bf16.msra.mxu1 %v6290_v58  ;;  %2429 = vmatprep.subr.bf16.mxu0 %v6295_v59  ;;  %v588_v58 = vrot.slane %v7141_v25, %v7154_v54  ;;  %v6359_v59 = vld [vmem:[#allocation5 + $0x3e8] ss:$48 sps:$4 sm:$0xff]   ;;  %v6367_v62 = vld [vmem:[#allocation5 + $0x38c] ss:$48 sps:$4 sm:$0xff]  }
 0x136   : > { %v2161_v3 = vpop.f32.mrf.mxu1  ;;  %2495 = vmatprep.subr.bf16.mxu1 %v6298_v61  ;;  %v6362_v61 = vld [vmem:[#allocation5 + $0x6e8] ss:$48 sps:$4 sm:$0xff]  }
 0x137   : > { %v6368_v3 = vld [vmem:[#allocation5 + $0x688] ss:$48 sps:$4 sm:$0xff]  }
 0x138   : > { %2430 = vmatpush2.bf16.msra.mxu0 %v6293_v63  ;;  %v6370_v63 = vld [vmem:[#allocation5 + $0x68c] ss:$48 sps:$4 sm:$0xff]  }
 0x139   : > { %2496 = vmatpush1.bf16.msra.mxu1 %v6296_v1  ;;  %2431 = vmatprep.subr.bf16.mxu0 %v6301_v2  ;;  %v6365_v2 = vld [vmem:[#allocation5 + $0x388] ss:$48 sps:$4 sm:$0xff]  }
 0x13a   : > { %2497 = vmatprep.subr.bf16.mxu1 %v6304_v4  ;;  %v6373_v4 = vld [vmem:[#allocation5 + $0x32c] ss:$48 sps:$4 sm:$0xff]  }
 0x13c   : > { %2432 = vmatpush2.bf16.msra.mxu0 %v6299_v5  ;;  %v6376_v5 = vld [vmem:[#allocation5 + $0x62c] ss:$48 sps:$4 sm:$0xff]  }
 0x13d   : > { %2498 = vmatpush1.bf16.msra.mxu1 %v6302_v6  ;;  %2433 = vmatprep.subr.bf16.mxu0 %v6307_v7  ;;  %v6371_v7 = vld [vmem:[#allocation5 + $0x328] ss:$48 sps:$4 sm:$0xff]  }
 0x13e   : > { %2499 = vmatprep.subr.bf16.mxu1 %v6310_v8  ;;  %v6374_v8 = vld [vmem:[#allocation5 + $0x628] ss:$48 sps:$4 sm:$0xff]  }
 0x140   : > { %2434 = vmatpush2.bf16.msra.mxu0 %v6305_v10  ;;  %v6379_v10 = vld [vmem:[#allocation7 + $0xac] ss:$12 sps:$4 sm:$0xff]  }
 0x141   : > { %2500 = vmatpush1.bf16.msra.mxu1 %v6308_v53  ;;  %2435 = vmatprep.subr.bf16.mxu0 %v6313_v11  ;;  %v6382_v53 = vld [vmem:[#allocation7 + $0x22c] ss:$12 sps:$4 sm:$0xff]  }
 0x142   : > { %2501 = vmatprep.subr.bf16.mxu1 %v6316_v12  ;;  %v6377_v12 = vld [vmem:[#allocation7 + $0xa8] ss:$12 sps:$4 sm:$0xff]  }
 0x144   : > { %2436 = vmatpush2.bf16.msra.mxu0 %v6311_v13  ;;  %v595_v13 = vsub.s32 3, %v7136_v21 }
 0x145   : > { %2502 = vmatpush1.bf16.msra.mxu1 %v6314_v14  ;;  %2437 = vmatprep.subr.bf16.mxu0 %v6319_v15  ;;  %v6380_v14 = vld [vmem:[#allocation7 + $0x228] ss:$12 sps:$4 sm:$0xff]  }
 0x146   : > { %2503 = vmatprep.subr.bf16.mxu1 %v6322_v17  ;;  %v6385_v15 = vld [vmem:[#allocation7 + $0x94] ss:$12 sps:$4 sm:$0xff]   ;;  %v6383_v17 = vld [vmem:[#allocation7 + $0x90] ss:$12 sps:$4 sm:$0xff]  }
 0x148   : > { %2438 = vmatpush2.bf16.msra.mxu0 %v6317_v18  ;;  %v6388_v18 = vld [vmem:[#allocation7 + $0x214] ss:$12 sps:$4 sm:$0xff]  }
 0x149   : > { %2504 = vmatpush1.bf16.msra.mxu1 %v6320_v19  ;;  %2439 = vmatprep.subr.bf16.mxu0 %v6325_v20 }
 0x14a   : > { %2505 = vmatprep.subr.bf16.mxu1 %v6328_v22  ;;  %v6386_v22 = vld [vmem:[#allocation7 + $0x210] ss:$12 sps:$4 sm:$0xff]  }
 0x14c   : > { %2440 = vmatpush2.bf16.msra.mxu0 %v6323_v23  ;;  %v6391_v23 = vld [vmem:[#allocation7 + $0x7c] ss:$12 sps:$4 sm:$0xff]  }
 0x14d   : > { %2506 = vmatpush1.bf16.msra.mxu1 %v6326_v24  ;;  %2532 = vmatprep.subr.bf16.mxu0 %v6334_v28 }
 0x14e   : > { %2507 = vmatprep.subr.bf16.mxu1 %v6331_v27 }
 0x14f   : > { %v2115_v35 = vpop.f32.mrf.mxu0  ;;  %2442 = vmatmul.mubr.bf16.vlgmr.msra.gmra.mxu0 %v7114_v9 }
 0x150   : > { %v2116_v40 = vadd.f32 %v2115_v35, %v584_v31  ;;  %2533 = vmatpush1.bf16.msra.mxu0 %v6332_v30  ;;  %2564 = vmatprep.mubr.bf16.mxu0 %v6935_v0  ;;  %v6353_v0 = vld [vmem:[#allocation5 + $0x448] ss:$48 sps:$4 sm:$0xff]   ;;  %v6397_v35 = vld [vmem:[#allocation7 + $0x64] ss:$12 sps:$4 sm:$0xff]  }
 0x151   : > { %2508 = vmatpush2.bf16.msra.mxu1 %v6329_v29  ;;  %v2117_v41 = vpop.f32.mrf.mxu0  ;;  %2534 = vmatprep.subr.bf16.mxu0 %v6340_v33  ;;  %v6389_v29 = vld [vmem:[#allocation7 + $0x78] ss:$12 sps:$4 sm:$0xff]   ;;  %v6394_v30 = vld [vmem:[#allocation7 + $0x1fc] ss:$12 sps:$4 sm:$0xff]  }
 0x152   : > { %2509 = vmatprep.subr.bf16.mxu1 %v6337_v32  ;;  %v7150_v42 = vadd.f32 %v7130_v56, %v2116_v40  ;;  %v6361_v56 = vld [vmem:[#allocation5 + $0x3ec] ss:$48 sps:$4 sm:$0xff]   ;;  %v2118_v1 = vadd.f32 %v2117_v41, %v588_v58  ;;  %v6392_v33 = vld [vmem:[#allocation7 + $0x1f8] ss:$12 sps:$4 sm:$0xff]  }
 0x153   : > { %v2119_v45 = vpop.f32.mrf.mxu0  ;;  %v6395_v40 = vld [vmem:[#allocation7 + $0x60] ss:$12 sps:$4 sm:$0xff]   ;;  %v6424_v58 = vld [vmem:[#allocation7 + $0x184] ss:$12 sps:$4 sm:$0xff]  }
 0x154   : > { %2535 = vmatpush1.bf16.msra.mxu0 %v6338_v37  ;;  %v2159_v6 = vadd.f32 %v7133_v60, %v2118_v1  ;;  %v596_v60 = vrot.slane %v7141_v25, %v595_v13  ;;  %v6400_v37 = vld [vmem:[#allocation7 + $0x1e4] ss:$12 sps:$4 sm:$0xff]   ;;  %v6398_v41 = vld [vmem:[#allocation7 + $0x1e0] ss:$12 sps:$4 sm:$0xff]   ;;  %v6401_v45 = vld [vmem:[#allocation7 + $0x48] ss:$12 sps:$4 sm:$0xff]  }
 0x155   : > { %2510 = vmatpush2.bf16.msra.mxu1 %v6335_v34  ;;  %v2120_v48 = vpop.f32.mrf.mxu0  ;;  %2536 = vmatprep.subr.bf16.mxu0 %v6346_v39  ;;  %v6425_v1 = vld [vmem:[#allocation7 + $0x168] ss:$12 sps:$4 sm:$0xff]  }
 0x156   : > { %2511 = vmatprep.subr.bf16.mxu1 %v6343_v38  ;;  %v2574_v11 = vmax.f32 %v2159_v6, 0.0  ;;  %v6412_v48 = vld [vmem:[#allocation7 + $0x1b4] ss:$12 sps:$4 sm:$0xff]  }
 0x158   : > { %2537 = vmatpush1.bf16.msra.mxu0 %v6344_v44  ;;  %v7160_v16 = vpack.c.bf16 %v2574_v11, %v2574_v11  ;;  %v6406_v44 = vld [vmem:[#allocation7 + $0x1cc] ss:$12 sps:$4 sm:$0xff]   ;;  %v6442_v11 = vld [vmem:[#allocation7 + $0x2bc] ss:$12 sps:$4 sm:$0xff]  }
 0x159   : > { %2512 = vmatpush2.bf16.msra.mxu1 %v6341_v43  ;;  %2538 = vmatprep.subr.bf16.mxu0 %v6352_v47  ;;  %v6403_v43 = vld [vmem:[#allocation7 + $0x4c] ss:$12 sps:$4 sm:$0xff]   ;;  %v6409_v47 = vld [vmem:[#allocation7 + $0x34] ss:$12 sps:$4 sm:$0xff]  }
 0x15a   : > { %2513 = vmatprep.subr.bf16.mxu1 %v6349_v46  ;;  %v6404_v46 = vld [vmem:[#allocation7 + $0x1c8] ss:$12 sps:$4 sm:$0xff]  }
 0x15c   : > { %2539 = vmatpush1.bf16.msra.mxu0 %v6350_v50  ;;  %v6407_v50 = vld [vmem:[#allocation7 + $0x30] ss:$12 sps:$4 sm:$0xff]  }
 0x15d   : > { %2514 = vmatpush2.bf16.msra.mxu1 %v6347_v49  ;;  %2540 = vmatprep.subr.bf16.mxu0 %v6358_v52  ;;  %v7176_v49 = vsub.s32 2, %v7136_v21  ;;  %v6415_v52 = vld [vmem:[#allocation7 + $0x1c] ss:$12 sps:$4 sm:$0xff]  }
 0x15e   : > { %2515 = vmatprep.subr.bf16.mxu1 %v6355_v51  ;;  %v6410_v51 = vld [vmem:[#allocation7 + $0x1b0] ss:$12 sps:$4 sm:$0xff]  }
 0x160   : > { %2541 = vmatpush1.bf16.msra.mxu0 %v6356_v55  ;;  %v6413_v55 = vld [vmem:[#allocation7 + $0x18] ss:$12 sps:$4 sm:$0xff]  }
 0x161   : > { %2516 = vmatpush2.bf16.msra.mxu1 %v6353_v0  ;;  %2542 = vmatprep.subr.bf16.mxu0 %v6364_v57  ;;  %v6418_v0 = vld [vmem:[#allocation7 + $0x19c] ss:$12 sps:$4 sm:$0xff]   ;;  %v6421_v57 = vld [vmem:[#allocation7 + $0x4] ss:$12 sps:$4 sm:$0xff]  }
 0x162   : > { %2517 = vmatprep.subr.bf16.mxu1 %v6361_v56  ;;  %v6416_v56 = vld [vmem:[#allocation7 + $0x198] ss:$12 sps:$4 sm:$0xff]  }
 0x164   : > { %2543 = vmatpush1.bf16.msra.mxu0 %v6362_v61  ;;  %v6422_v61 = vld [vmem:[#allocation7 + $0x180] ss:$12 sps:$4 sm:$0xff]  }
 0x165   : > { %2518 = vmatpush2.bf16.msra.mxu1 %v6359_v59  ;;  %2544 = vmatprep.subr.bf16.mxu0 %v6370_v63  ;;  %v6419_v59 = vld [vmem:[#allocation7] ss:$12 sps:$4 sm:$0xff]  }
 0x166   : > { %2519 = vmatprep.subr.bf16.mxu1 %v6367_v62  ;;  %v6427_v62 = vld [vmem:[#allocation7 + $0x16c] ss:$12 sps:$4 sm:$0xff]  }
 0x167   : > { %v6430_v63 = vld [vmem:[#allocation7 + $0x2ec] ss:$12 sps:$4 sm:$0xff]  }
 0x168   : > { %2545 = vmatpush1.bf16.msra.mxu0 %v6368_v3  ;;  %v6433_v3 = vld [vmem:[#allocation7 + $0x154] ss:$12 sps:$4 sm:$0xff]  }
 0x169   : > { %2520 = vmatpush2.bf16.msra.mxu1 %v6365_v2  ;;  %2546 = vmatprep.subr.bf16.mxu0 %v6376_v5  ;;  %v6428_v2 = vld [vmem:[#allocation7 + $0x2e8] ss:$12 sps:$4 sm:$0xff]  }
 0x16a   : > { %2521 = vmatprep.subr.bf16.mxu1 %v6373_v4  ;;  %v6431_v4 = vld [vmem:[#allocation7 + $0x150] ss:$12 sps:$4 sm:$0xff]   ;;  %v6436_v5 = vld [vmem:[#allocation7 + $0x2d4] ss:$12 sps:$4 sm:$0xff]  }
 0x16c   : > { %2547 = vmatpush1.bf16.msra.mxu0 %v6374_v8 }
 0x16d   : > { %2522 = vmatpush2.bf16.msra.mxu1 %v6371_v7  ;;  %4534 = vmatprep.subr.bf16.mxu0 %v6379_v10  ;;  %v6434_v7 = vld [vmem:[#allocation7 + $0x2d0] ss:$12 sps:$4 sm:$0xff]  }
 0x16e   : > { %4575 = vmatprep.subr.bf16.mxu1 %v6382_v53  ;;  %v6439_v10 = vld [vmem:[#allocation7 + $0x13c] ss:$12 sps:$4 sm:$0xff]   ;;  %v6437_v53 = vld [vmem:[#allocation7 + $0x138] ss:$12 sps:$4 sm:$0xff]  }
 0x16f   : > { %v7167_v20 = vpop.f32.mrf.mxu0  ;;  %2565 = vmatmul.mubr.bf16.vlgmr.msra.gmra.mxu0 %v7105_v36 }
 0x170   : > { %v7165_v19 = vpop.f32.mrf.mxu1  ;;  %2524 = vmatmul.mubr.bf16.vlgmr.msra.gmra.mxu1 %v7114_v9  ;;  %4535 = vmatpush1.bf16.msra.mxu0 %v6377_v12 }
 0x171   : > { %4566 = vmatprep.mubr.bf16.mxu0 %v7160_v16  ;;  %4576 = vmatpush1.bf16.msra.mxu1 %v6380_v14  ;;  %v2240_v27 = vpop.f32.mrf.mxu0  ;;  %v6440_v14 = vld [vmem:[#allocation7 + $0x2b8] ss:$12 sps:$4 sm:$0xff]  }
 0x172   : > { %v2199_v24 = vpop.f32.mrf.mxu1  ;;  %4536 = vmatprep.subr.bf16.mxu0 %v6385_v15  ;;  %4577 = vmatprep.subr.bf16.mxu1 %v6388_v18  ;;  %v6448_v18 = vld [vmem:[#allocation7 + $0x2a4] ss:$12 sps:$4 sm:$0xff]  }
 0x173   : > { %v2200_v28 = vadd.f32 %v2199_v24, %v596_v60  ;;  %v2242_v32 = vpop.f32.mrf.mxu0  ;;  %v6445_v60 = vld [vmem:[#allocation7 + $0x124] ss:$12 sps:$4 sm:$0xff]   ;;  %v6449_v24 = vld [vmem:[#allocation7 + $0x108] ss:$12 sps:$4 sm:$0xff]  }
 0x174   : > { %v2201_v31 = vpop.f32.mrf.mxu1  ;;  %4537 = vmatpush1.bf16.msra.mxu0 %v6383_v17  ;;  %v6443_v17 = vld [vmem:[#allocation7 + $0x120] ss:$12 sps:$4 sm:$0xff]  }
 0x175   : > { %v2241_v34 = vadd.f32 %v2240_v27, %v2200_v28  ;;  %4578 = vmatpush1.bf16.msra.mxu1 %v6386_v22  ;;  %v2243_v9 = vpop.f32.mrf.mxu0  ;;  %4538 = vmatprep.subr.bf16.mxu0 %v6391_v23  ;;  %v6446_v22 = vld [vmem:[#allocation7 + $0x2a0] ss:$12 sps:$4 sm:$0xff]   ;;  %v6452_v28 = vld [vmem:[#allocation7 + $0x288] ss:$12 sps:$4 sm:$0xff]   ;;  %v592_v31 = vrot.slane %v7141_v25, %v7176_v49 }
 0x176   : > { %v2202_v36 = vpop.f32.mrf.mxu1  ;;  %4579 = vmatprep.subr.bf16.mxu1 %v6394_v30  ;;  %v6451_v23 = vld [vmem:[#allocation7 + $0x10c] ss:$12 sps:$4 sm:$0xff]   ;;  %v603_v30 = vsub.s32 5, %v7136_v21  ;;  %v6460_v32 = vld [vmem:[#allocation7 + $0x274] ss:$12 sps:$4 sm:$0xff]  }
 0x177   : > { %v2576_v38 = vmax.f32 %v2241_v34, 0.0  ;;  %v6454_v27 = vld [vmem:[#allocation7 + $0x28c] ss:$12 sps:$4 sm:$0xff]   ;;  %v6458_v34 = vld [vmem:[#allocation7 + $0x270] ss:$12 sps:$4 sm:$0xff]   ;;  %v2198_v9 = vadd.f32 %v7165_v19, %v592_v31  ;;  %v2573_v19 = vmax.f32 %v7150_v42, 0.0 }
 0x178   : > { %4539 = vmatpush1.bf16.msra.mxu0 %v6389_v29  ;;  %v6457_v29 = vld [vmem:[#allocation7 + $0xf4] ss:$12 sps:$4 sm:$0xff]   ;;  %v6463_v36 = vld [vmem:[#allocation7 + $0xdc] ss:$12 sps:$4 sm:$0xff]   ;;  %v6520_v31 = vld [vmem:[#allocation7 + $0x484] ss:$12 sps:$4 sm:$0xff]  }
 0x179   : > { %v7172_v39 = vpack.c.bf16 %v2576_v38, %v2576_v38  ;;  %4580 = vmatpush1.bf16.msra.mxu1 %v6392_v33  ;;  %4540 = vmatprep.subr.bf16.mxu0 %v6397_v35  ;;  %v6455_v33 = vld [vmem:[#allocation7 + $0xf0] ss:$12 sps:$4 sm:$0xff]   ;;  %v6464_v38 = vld [vmem:[#allocation7 + $0x258] ss:$12 sps:$4 sm:$0xff]  }
 0x17a   : > { %4581 = vmatprep.subr.bf16.mxu1 %v6400_v37  ;;  %v6466_v35 = vld [vmem:[#allocation7 + $0x25c] ss:$12 sps:$4 sm:$0xff]   ;;  %v6461_v37 = vld [vmem:[#allocation7 + $0xd8] ss:$12 sps:$4 sm:$0xff]  }
 0x17b   : > { %4607 = vmatprep.mubr.bf16.mxu1 %v7172_v39 }
 0x17c   : > { %4541 = vmatpush1.bf16.msra.mxu0 %v6395_v40  ;;  %v6469_v40 = vld [vmem:[#allocation7 + $0xc4] ss:$12 sps:$4 sm:$0xff]  }
 0x17d   : > { %4582 = vmatpush1.bf16.msra.mxu1 %v6398_v41  ;;  %4542 = vmatprep.subr.bf16.mxu0 %v6403_v43  ;;  %v2239_v41 = vadd.f32 %v7167_v20, %v2198_v9  ;;  %v6472_v43 = vld [vmem:[#allocation7 + $0x244] ss:$12 sps:$4 sm:$0xff]   ;;  %v7188_v20 = vpack.c.bf16 %v2573_v19, %v2573_v19  ;;  %v611_v9 = vsub.s32 7, %v7136_v21 }
 0x17e   : > { %4583 = vmatprep.subr.bf16.mxu1 %v6406_v44  ;;  %v6467_v44 = vld [vmem:[#allocation7 + $0xc0] ss:$12 sps:$4 sm:$0xff]  }
 0x180   : > { %4543 = vmatpush1.bf16.msra.mxu0 %v6401_v45  ;;  %v6470_v45 = vld [vmem:[#allocation7 + $0x240] ss:$12 sps:$4 sm:$0xff]  }
 0x181   : > { %4584 = vmatpush1.bf16.msra.mxu1 %v6404_v46  ;;  %4544 = vmatprep.subr.bf16.mxu0 %v6409_v47  ;;  %v6475_v46 = vld [vmem:[#allocation7 + $0x3ac] ss:$12 sps:$4 sm:$0xff]  }
 0x182   : > { %4585 = vmatprep.subr.bf16.mxu1 %v6412_v48  ;;  %v6478_v47 = vld [vmem:[#allocation7 + $0x52c] ss:$12 sps:$4 sm:$0xff]   ;;  %v2575_v48 = vmax.f32 %v2239_v41, 0.0 }
 0x184   : > { %4545 = vmatpush1.bf16.msra.mxu0 %v6407_v50  ;;  %v6473_v50 = vld [vmem:[#allocation7 + $0x3a8] ss:$12 sps:$4 sm:$0xff]  }
 0x185   : > { %4586 = vmatpush1.bf16.msra.mxu1 %v6410_v51  ;;  %4546 = vmatprep.subr.bf16.mxu0 %v6415_v52  ;;  %v6476_v51 = vld [vmem:[#allocation7 + $0x528] ss:$12 sps:$4 sm:$0xff]  }
 0x186   : > { %4587 = vmatprep.subr.bf16.mxu1 %v6418_v0  ;;  %v6481_v52 = vld [vmem:[#allocation7 + $0x394] ss:$12 sps:$4 sm:$0xff]   ;;  %v7190_v0 = vpack.c.bf16 %v2575_v48, %v2575_v48  ;;  %v6530_v48 = vld [vmem:[#allocation7 + $0x5d0] ss:$12 sps:$4 sm:$0xff]  }
 0x188   : > { %4547 = vmatpush1.bf16.msra.mxu0 %v6413_v55  ;;  %v604_v55 = vrot.slane %v7141_v25, %v603_v30  ;;  %v6517_v30 = vld [vmem:[#allocation7 + $0x304] ss:$12 sps:$4 sm:$0xff]  }
 0x189   : > { %4588 = vmatpush1.bf16.msra.mxu1 %v6416_v56  ;;  %4548 = vmatprep.subr.bf16.mxu0 %v6421_v57  ;;  %v6479_v56 = vld [vmem:[#allocation7 + $0x390] ss:$12 sps:$4 sm:$0xff]   ;;  %v6484_v57 = vld [vmem:[#allocation7 + $0x514] ss:$12 sps:$4 sm:$0xff]  }
 0x18a   : > { %4589 = vmatprep.subr.bf16.mxu1 %v6424_v58  ;;  %v6482_v58 = vld [vmem:[#allocation7 + $0x510] ss:$12 sps:$4 sm:$0xff]  }
 0x18c   : > { %4549 = vmatpush1.bf16.msra.mxu0 %v6419_v59 }
 0x18d   : > { %4590 = vmatpush1.bf16.msra.mxu1 %v6422_v61  ;;  %4550 = vmatprep.subr.bf16.mxu0 %v6427_v62  ;;  %v6487_v61 = vld [vmem:[#allocation7 + $0x37c] ss:$12 sps:$4 sm:$0xff]  }
 0x18e   : > { %4591 = vmatprep.subr.bf16.mxu1 %v6430_v63  ;;  %v6490_v63 = vld [vmem:[#allocation7 + $0x4fc] ss:$12 sps:$4 sm:$0xff]  }
 0x190   : > { %v7178_v6 = vpop.f32.mrf.mxu1  ;;  %4551 = vmatpush2.bf16.msra.mxu0 %v6425_v1 }
 0x191   : > { %4592 = vmatpush2.bf16.msra.mxu1 %v6428_v2  ;;  %4552 = vmatprep.subr.bf16.mxu0 %v6433_v3  ;;  %v6485_v2 = vld [vmem:[#allocation7 + $0x378] ss:$12 sps:$4 sm:$0xff]  }
 0x192   : > { %v7180_v8 = vpop.f32.mrf.mxu1  ;;  %4593 = vmatprep.subr.bf16.mxu1 %v6436_v5  ;;  %v6488_v3 = vld [vmem:[#allocation7 + $0x4f8] ss:$12 sps:$4 sm:$0xff]  }
 0x193   : > { %v6493_v5 = vld [vmem:[#allocation7 + $0x364] ss:$12 sps:$4 sm:$0xff]  }
 0x194   : > { %v2324_v12 = vpop.f32.mrf.mxu1  ;;  %4553 = vmatpush2.bf16.msra.mxu0 %v6431_v4 }
 0x195   : > { %4594 = vmatpush2.bf16.msra.mxu1 %v6434_v7  ;;  %4554 = vmatprep.subr.bf16.mxu0 %v6439_v10  ;;  %v6491_v10 = vld [vmem:[#allocation7 + $0x360] ss:$12 sps:$4 sm:$0xff]  }
 0x196   : > { %v2325_v15 = vpop.f32.mrf.mxu1  ;;  %4595 = vmatprep.subr.bf16.mxu1 %v6442_v11  ;;  %v6494_v11 = vld [vmem:[#allocation7 + $0x4e0] ss:$12 sps:$4 sm:$0xff]  }
 0x197   : > { %v6497_v15 = vld [vmem:[#allocation7 + $0x348] ss:$12 sps:$4 sm:$0xff]  }
 0x198   : > { %4555 = vmatpush2.bf16.msra.mxu0 %v6437_v53  ;;  %v6496_v53 = vld [vmem:[#allocation7 + $0x4e4] ss:$12 sps:$4 sm:$0xff]  }
 0x199   : > { %4596 = vmatpush2.bf16.msra.mxu1 %v6440_v14  ;;  %4556 = vmatprep.subr.bf16.mxu0 %v6445_v60  ;;  %v6499_v14 = vld [vmem:[#allocation7 + $0x34c] ss:$12 sps:$4 sm:$0xff]   ;;  %v6500_v60 = vld [vmem:[#allocation7 + $0x4c8] ss:$12 sps:$4 sm:$0xff]  }
 0x19a   : > { %4597 = vmatprep.subr.bf16.mxu1 %v6448_v18  ;;  %v6508_v18 = vld [vmem:[#allocation7 + $0x4b4] ss:$12 sps:$4 sm:$0xff]  }
 0x19c   : > { %4557 = vmatpush2.bf16.msra.mxu0 %v6443_v17  ;;  %v6505_v17 = vld [vmem:[#allocation7 + $0x334] ss:$12 sps:$4 sm:$0xff]  }
 0x19d   : > { %4598 = vmatpush2.bf16.msra.mxu1 %v6446_v22  ;;  %4558 = vmatprep.subr.bf16.mxu0 %v6451_v23  ;;  %v6503_v22 = vld [vmem:[#allocation7 + $0x330] ss:$12 sps:$4 sm:$0xff]  }
 0x19e   : > { %4599 = vmatprep.subr.bf16.mxu1 %v6454_v27  ;;  %v6506_v23 = vld [vmem:[#allocation7 + $0x4b0] ss:$12 sps:$4 sm:$0xff]  }
 0x19f   : > { %v6514_v27 = vld [vmem:[#allocation7 + $0x49c] ss:$12 sps:$4 sm:$0xff]  }
 0x1a0   : > { %4559 = vmatpush2.bf16.msra.mxu0 %v6449_v24  ;;  %v6511_v24 = vld [vmem:[#allocation7 + $0x31c] ss:$12 sps:$4 sm:$0xff]  }
 0x1a1   : > { %4600 = vmatpush2.bf16.msra.mxu1 %v6452_v28  ;;  %4560 = vmatprep.subr.bf16.mxu0 %v6457_v29  ;;  %v6509_v28 = vld [vmem:[#allocation7 + $0x318] ss:$12 sps:$4 sm:$0xff]  }
 0x1a2   : > { %4601 = vmatprep.subr.bf16.mxu1 %v6460_v32  ;;  %v6512_v29 = vld [vmem:[#allocation7 + $0x498] ss:$12 sps:$4 sm:$0xff]   ;;  %v6515_v32 = vld [vmem:[#allocation7 + $0x300] ss:$12 sps:$4 sm:$0xff]  }
 0x1a4   : > { %4561 = vmatpush2.bf16.msra.mxu0 %v6455_v33  ;;  %v6518_v33 = vld [vmem:[#allocation7 + $0x480] ss:$12 sps:$4 sm:$0xff]  }
 0x1a5   : > { %4602 = vmatpush2.bf16.msra.mxu1 %v6458_v34  ;;  %4562 = vmatprep.subr.bf16.mxu0 %v6463_v36  ;;  %v6523_v34 = vld [vmem:[#allocation7 + $0x46c] ss:$12 sps:$4 sm:$0xff]  }
 0x1a6   : > { %4603 = vmatprep.subr.bf16.mxu1 %v6466_v35  ;;  %v6526_v36 = vld [vmem:[#allocation7 + $0x5ec] ss:$12 sps:$4 sm:$0xff]   ;;  %v6521_v35 = vld [vmem:[#allocation7 + $0x468] ss:$12 sps:$4 sm:$0xff]  }
 0x1a8   : > { %4563 = vmatpush2.bf16.msra.mxu0 %v6461_v37  ;;  %v6524_v37 = vld [vmem:[#allocation7 + $0x5e8] ss:$12 sps:$4 sm:$0xff]  }
 0x1a9   : > { %4604 = vmatpush2.bf16.msra.mxu1 %v6464_v38  ;;  %4564 = vmatprep.subr.bf16.mxu0 %v6469_v40  ;;  %v6529_v38 = vld [vmem:[#allocation7 + $0x454] ss:$12 sps:$4 sm:$0xff]  }
 0x1aa   : > { %4605 = vmatprep.subr.bf16.mxu1 %v6472_v43  ;;  %v6761_v40 = vld [vmem:[%s7338_s2] sm:$0xff] }
 0x1ab   : > { %v612_v41 = vrot.slane %v6761_v40, %v611_v9  ;;  %v6532_v43 = vld [vmem:[#allocation7 + $0x5d4] ss:$12 sps:$4 sm:$0xff]  }
 0x1ac   : > { %4565 = vmatpush2.bf16.msra.mxu0 %v6467_v44  ;;  %v6566_v9 = vld [vmem:[#allocation7 + $0x540] ss:$12 sps:$4 sm:$0xff]  }
 0x1ad   : > { %4606 = vmatpush2.bf16.msra.mxu1 %v6470_v45  ;;  %4616 = vmatprep.subr.bf16.mxu0 %v6475_v46  ;;  %v6527_v46 = vld [vmem:[#allocation7 + $0x450] ss:$12 sps:$4 sm:$0xff]  }
 0x1ae   : > { %4657 = vmatprep.subr.bf16.mxu1 %v6478_v47 }
 0x1af   : > { %v7193_v42 = vpop.f32.mrf.mxu0  ;;  %4567 = vmatmul.mubr.bf16.vlgmr.msra.gmra.mxu0 %v7188_v20 }
 0x1b0   : > { %4608 = vmatmul.mubr.bf16.vlgmr.msra.gmra.mxu1 %v7190_v0  ;;  %4617 = vmatpush1.bf16.msra.mxu0 %v6473_v50  ;;  %v6535_v50 = vld [vmem:[#allocation7 + $0x43c] ss:$12 sps:$4 sm:$0xff]  }
 0x1b1   : > { %4658 = vmatpush1.bf16.msra.mxu1 %v6476_v51  ;;  %v2281_v59 = vpop.f32.mrf.mxu0  ;;  %4618 = vmatprep.subr.bf16.mxu0 %v6481_v52  ;;  %v6538_v52 = vld [vmem:[#allocation7 + $0x5bc] ss:$12 sps:$4 sm:$0xff]  }
 0x1b2   : > { %v2282_v62 = vadd.f32 %v2281_v59, %v604_v55  ;;  %4659 = vmatprep.subr.bf16.mxu1 %v6484_v57  ;;  %v6536_v59 = vld [vmem:[#allocation7 + $0x5b8] ss:$12 sps:$4 sm:$0xff]  }
 0x1b3   : > { %v2283_v1 = vpop.f32.mrf.mxu0 }
 0x1b4   : > { %v2323_v25 = vadd.f32 %v7180_v8, %v2282_v62  ;;  %4619 = vmatpush1.bf16.msra.mxu0 %v6479_v56  ;;  %v6502_v8 = vld [vmem:[#allocation7 + $0x4cc] ss:$12 sps:$4 sm:$0xff]   ;;  %v599_v1 = vsub.s32 4, %v7136_v21 }
 0x1b5   : > { %4660 = vmatpush1.bf16.msra.mxu1 %v6482_v58  ;;  %v2284_v4 = vpop.f32.mrf.mxu0  ;;  %4620 = vmatprep.subr.bf16.mxu0 %v6487_v61  ;;  %v6533_v58 = vld [vmem:[#allocation7 + $0x438] ss:$12 sps:$4 sm:$0xff]  }
 0x1b6   : > { %v2578_v7 = vmax.f32 %v2323_v25, 0.0  ;;  %4661 = vmatprep.subr.bf16.mxu1 %v6490_v63  ;;  %v6541_v63 = vld [vmem:[#allocation7 + $0x424] ss:$12 sps:$4 sm:$0xff]   ;;  %v6539_v25 = vld [vmem:[#allocation7 + $0x420] ss:$12 sps:$4 sm:$0xff]  }
 0x1b7   : > { %v6542_v4 = vld [vmem:[#allocation7 + $0x5a0] ss:$12 sps:$4 sm:$0xff]  }
 0x1b8   : > { %v7198_v12 = vpack.c.bf16 %v2578_v7, %v2578_v7  ;;  %4621 = vmatpush1.bf16.msra.mxu0 %v6485_v2  ;;  %v6547_v7 = vld [vmem:[#allocation7 + $0x40c] ss:$12 sps:$4 sm:$0xff]  }
 0x1b9   : > { %4662 = vmatpush1.bf16.msra.mxu1 %v6488_v3  ;;  %4622 = vmatprep.subr.bf16.mxu0 %v6493_v5  ;;  %v6544_v3 = vld [vmem:[#allocation7 + $0x5a4] ss:$12 sps:$4 sm:$0xff]  }
 0x1ba   : > { %4648 = vmatprep.mubr.bf16.mxu0 %v7198_v12  ;;  %4663 = vmatprep.subr.bf16.mxu1 %v6496_v53  ;;  %v6550_v53 = vld [vmem:[#allocation7 + $0x58c] ss:$12 sps:$4 sm:$0xff]  }
 0x1bc   : > { %4623 = vmatpush1.bf16.msra.mxu0 %v6491_v10  ;;  %v607_v10 = vsub.s32 6, %v7136_v21 }
 0x1bd   : > { %4664 = vmatpush1.bf16.msra.mxu1 %v6494_v11  ;;  %4624 = vmatprep.subr.bf16.mxu0 %v6499_v14  ;;  %v6545_v11 = vld [vmem:[#allocation7 + $0x408] ss:$12 sps:$4 sm:$0xff]   ;;  %v600_v14 = vrot.slane %v6761_v40, %v599_v1  ;;  %v6604_v1 = vld [vmem:[#allocation7 + $0x7cc] ss:$12 sps:$4 sm:$0xff]  }
 0x1be   : > { %4665 = vmatprep.subr.bf16.mxu1 %v6502_v8  ;;  %v6548_v8 = vld [vmem:[#allocation7 + $0x588] ss:$12 sps:$4 sm:$0xff]  }
 0x1c0   : > { %4625 = vmatpush1.bf16.msra.mxu0 %v6497_v15  ;;  %v6553_v15 = vld [vmem:[#allocation7 + $0x3f4] ss:$12 sps:$4 sm:$0xff]  }
 0x1c1   : > { %4666 = vmatpush1.bf16.msra.mxu1 %v6500_v60  ;;  %4626 = vmatprep.subr.bf16.mxu0 %v6505_v17  ;;  %v608_v60 = vrot.slane %v6761_v40, %v607_v10  ;;  %v6556_v17 = vld [vmem:[#allocation7 + $0x574] ss:$12 sps:$4 sm:$0xff]   ;;  %v6601_v10 = vld [vmem:[#allocation7 + $0x61c] ss:$12 sps:$4 sm:$0xff]  }
 0x1c2   : > { %4667 = vmatprep.subr.bf16.mxu1 %v6508_v18  ;;  %v6551_v18 = vld [vmem:[#allocation7 + $0x3f0] ss:$12 sps:$4 sm:$0xff]  }
 0x1c4   : > { %4627 = vmatpush1.bf16.msra.mxu0 %v6503_v22  ;;  %v2280_v22 = vadd.f32 %v7193_v42, %v600_v14  ;;  %v6563_v42 = vld [vmem:[#allocation7 + $0x3c0] ss:$12 sps:$4 sm:$0xff]   ;;  %v6599_v14 = vld [vmem:[#allocation7 + $0x618] ss:$12 sps:$4 sm:$0xff]  }
 0x1c5   : > { %4668 = vmatpush1.bf16.msra.mxu1 %v6506_v23  ;;  %4628 = vmatprep.subr.bf16.mxu0 %v6511_v24  ;;  %v6554_v23 = vld [vmem:[#allocation7 + $0x570] ss:$12 sps:$4 sm:$0xff]  }
 0x1c6   : > { %4669 = vmatprep.subr.bf16.mxu1 %v6514_v27  ;;  %v6559_v24 = vld [vmem:[#allocation7 + $0x3dc] ss:$12 sps:$4 sm:$0xff]  }
 0x1c8   : > { %4629 = vmatpush1.bf16.msra.mxu0 %v6509_v28  ;;  %v6562_v28 = vld [vmem:[#allocation7 + $0x55c] ss:$12 sps:$4 sm:$0xff]  }
 0x1c9   : > { %4670 = vmatpush1.bf16.msra.mxu1 %v6512_v29  ;;  %4630 = vmatprep.subr.bf16.mxu0 %v6517_v30  ;;  %v6557_v29 = vld [vmem:[#allocation7 + $0x3d8] ss:$12 sps:$4 sm:$0xff]   ;;  %v2321_v30 = vadd.f32 %v7178_v6, %v2280_v22  ;;  %v6569_v6 = vld [vmem:[#allocation7 + $0x6a8] ss:$12 sps:$4 sm:$0xff]   ;;  %v6620_v22 = vld [vmem:[#allocation7 + $0x780] ss:$12 sps:$4 sm:$0xff]  }
 0x1ca   : > { %4671 = vmatprep.subr.bf16.mxu1 %v6520_v31  ;;  %v6560_v31 = vld [vmem:[#allocation7 + $0x558] ss:$12 sps:$4 sm:$0xff]  }
 0x1cc   : > { %4631 = vmatpush1.bf16.msra.mxu0 %v6515_v32  ;;  %v6565_v32 = vld [vmem:[#allocation7 + $0x3c4] ss:$12 sps:$4 sm:$0xff]  }
 0x1cd   : > { %4672 = vmatpush1.bf16.msra.mxu1 %v6518_v33  ;;  %4632 = vmatprep.subr.bf16.mxu0 %v6523_v34  ;;  %v6568_v34 = vld [vmem:[#allocation7 + $0x544] ss:$12 sps:$4 sm:$0xff]  }
 0x1ce   : > { %4673 = vmatprep.subr.bf16.mxu1 %v6526_v36  ;;  %v2577_v36 = vmax.f32 %v2321_v30, 0.0 }
 0x1cf   : > { %v7205_v45 = vpop.f32.mrf.mxu0 }
 0x1d0   : > { %v2361_v44 = vpop.f32.mrf.mxu1  ;;  %4633 = vmatpush2.bf16.msra.mxu0 %v6521_v35  ;;  %v6571_v35 = vld [vmem:[#allocation7 + $0x6ac] ss:$12 sps:$4 sm:$0xff]   ;;  %v7215_v40 = vpack.c.bf16 %v2577_v36, %v2577_v36  ;;  %v6632_v36 = vld [vmem:[#allocation7 + $0x8d0] ss:$12 sps:$4 sm:$0xff]  }
 0x1d1   : > { %4674 = vmatpush2.bf16.msra.mxu1 %v6524_v37  ;;  %v2404_v19 = vpop.f32.mrf.mxu0  ;;  %4634 = vmatprep.subr.bf16.mxu0 %v6529_v38  ;;  %v2362_v27 = vadd.f32 %v2361_v44, %v608_v60  ;;  %v6580_v38 = vld [vmem:[#allocation7 + $0x82c] ss:$12 sps:$4 sm:$0xff]   ;;  %v6622_v60 = vld [vmem:[#allocation7 + $0x784] ss:$12 sps:$4 sm:$0xff]  }
 0x1d2   : > { %v2363_v47 = vpop.f32.mrf.mxu1  ;;  %4675 = vmatprep.subr.bf16.mxu1 %v6532_v43  ;;  %v6578_v43 = vld [vmem:[#allocation7 + $0x828] ss:$12 sps:$4 sm:$0xff]  }
 0x1d3   : > { %v2364_v51 = vadd.f32 %v2363_v47, %v612_v41  ;;  %v2406_v56 = vpop.f32.mrf.mxu0  ;;  %v2403_v33 = vadd.f32 %v7205_v45, %v2362_v27  ;;  %v6574_v41 = vld [vmem:[#allocation7 + $0x694] ss:$12 sps:$4 sm:$0xff]   ;;  %v6572_v47 = vld [vmem:[#allocation7 + $0x690] ss:$12 sps:$4 sm:$0xff]   ;;  %v7228_v27 = vld [vmem:[%s7338_s2 + $0x8] sm:$0xf] }
 0x1d4   : > { %v2365_v55 = vpop.f32.mrf.mxu1  ;;  %4635 = vmatpush2.bf16.msra.mxu0 %v6527_v46  ;;  %v6586_v45 = vld [vmem:[#allocation7 + $0x814] ss:$12 sps:$4 sm:$0xff]   ;;  %v620_v30 = vrot.slane %v7228_v27, %v7154_v54 }
 0x1d5   : > { %v2405_v57 = vadd.f32 %v2404_v19, %v2364_v51  ;;  %4676 = vmatpush2.bf16.msra.mxu1 %v6530_v48  ;;  %v2407_v62 = vpop.f32.mrf.mxu0  ;;  %4636 = vmatprep.subr.bf16.mxu0 %v6535_v50  ;;  %v2579_v37 = vmax.f32 %v2403_v33, 0.0  ;;  %v6577_v48 = vld [vmem:[#allocation7 + $0x67c] ss:$12 sps:$4 sm:$0xff]   ;;  %v6575_v55 = vld [vmem:[#allocation7 + $0x678] ss:$12 sps:$4 sm:$0xff]  }
 0x1d6   : > { %v2366_v61 = vpop.f32.mrf.mxu1  ;;  %4677 = vmatprep.subr.bf16.mxu1 %v6538_v52  ;;  %v6584_v50 = vld [vmem:[#allocation7 + $0x810] ss:$12 sps:$4 sm:$0xff]   ;;  %v6589_v62 = vld [vmem:[#allocation7 + $0x64c] ss:$12 sps:$4 sm:$0xff]  }
 0x1d7   : > { %v2580_v2 = vmax.f32 %v2405_v57, 0.0  ;;  %v7217_v44 = vpack.c.bf16 %v2579_v37, %v2579_v37  ;;  %v6592_v51 = vld [vmem:[#allocation7 + $0x7fc] ss:$12 sps:$4 sm:$0xff]   ;;  %v6583_v57 = vld [vmem:[#allocation7 + $0x664] ss:$12 sps:$4 sm:$0xff]  }
 0x1d8   : > { %4637 = vmatpush2.bf16.msra.mxu0 %v6533_v58  ;;  %v6590_v58 = vld [vmem:[#allocation7 + $0x7f8] ss:$12 sps:$4 sm:$0xff]   ;;  %v6581_v61 = vld [vmem:[#allocation7 + $0x660] ss:$12 sps:$4 sm:$0xff]   ;;  %v6617_v33 = vld [vmem:[#allocation7 + $0x750] ss:$12 sps:$4 sm:$0xff]  }
 0x1d9   : > { %v7208_v5 = vpack.c.bf16 %v2580_v2, %v2580_v2  ;;  %4678 = vmatpush2.bf16.msra.mxu1 %v6536_v59  ;;  %4638 = vmatprep.subr.bf16.mxu0 %v6541_v63  ;;  %v6598_v59 = vld [vmem:[#allocation7 + $0x7e4] ss:$12 sps:$4 sm:$0xff]   ;;  %v6596_v63 = vld [vmem:[#allocation7 + $0x7e0] ss:$12 sps:$4 sm:$0xff]   ;;  %v6587_v2 = vld [vmem:[#allocation7 + $0x648] ss:$12 sps:$4 sm:$0xff]  }
 0x1da   : > { %4679 = vmatprep.subr.bf16.mxu1 %v6544_v3  ;;  %v6602_v3 = vld [vmem:[#allocation7 + $0x7c8] ss:$12 sps:$4 sm:$0xff]  }
 0x1db   : > { %4689 = vmatprep.mubr.bf16.mxu1 %v7208_v5 }
 0x1dc   : > { %4639 = vmatpush2.bf16.msra.mxu0 %v6539_v25  ;;  %v6595_v25 = vld [vmem:[#allocation7 + $0x634] ss:$12 sps:$4 sm:$0xff]  }
 0x1dd   : > { %4680 = vmatpush2.bf16.msra.mxu1 %v6542_v4  ;;  %4640 = vmatprep.subr.bf16.mxu0 %v6547_v7  ;;  %v6610_v4 = vld [vmem:[#allocation7 + $0x7b4] ss:$12 sps:$4 sm:$0xff]   ;;  %v6593_v7 = vld [vmem:[#allocation7 + $0x630] ss:$12 sps:$4 sm:$0xff]  }
 0x1de   : > { %4681 = vmatprep.subr.bf16.mxu1 %v6550_v53  ;;  %v6608_v53 = vld [vmem:[#allocation7 + $0x7b0] ss:$12 sps:$4 sm:$0xff]  }
 0x1e0   : > { %4641 = vmatpush2.bf16.msra.mxu0 %v6545_v11  ;;  %v6616_v11 = vld [vmem:[#allocation7 + $0x79c] ss:$12 sps:$4 sm:$0xff]  }
 0x1e1   : > { %4682 = vmatpush2.bf16.msra.mxu1 %v6548_v8  ;;  %4642 = vmatprep.subr.bf16.mxu0 %v6553_v15  ;;  %v6607_v8 = vld [vmem:[#allocation7 + $0x604] ss:$12 sps:$4 sm:$0xff]  }
 0x1e2   : > { %4683 = vmatprep.subr.bf16.mxu1 %v6556_v17  ;;  %v6614_v15 = vld [vmem:[#allocation7 + $0x798] ss:$12 sps:$4 sm:$0xff]   ;;  %v6605_v17 = vld [vmem:[#allocation7 + $0x600] ss:$12 sps:$4 sm:$0xff]  }
 0x1e4   : > { %4643 = vmatpush2.bf16.msra.mxu0 %v6551_v18  ;;  %v6613_v18 = vld [vmem:[#allocation7 + $0x76c] ss:$12 sps:$4 sm:$0xff]  }
 0x1e5   : > { %4684 = vmatpush2.bf16.msra.mxu1 %v6554_v23  ;;  %4644 = vmatprep.subr.bf16.mxu0 %v6559_v24  ;;  %v6628_v23 = vld [vmem:[#allocation7 + $0x8ec] ss:$12 sps:$4 sm:$0xff]   ;;  %v6611_v24 = vld [vmem:[#allocation7 + $0x768] ss:$12 sps:$4 sm:$0xff]  }
 0x1e6   : > { %4685 = vmatprep.subr.bf16.mxu1 %v6562_v28  ;;  %v6619_v28 = vld [vmem:[#allocation7 + $0x754] ss:$12 sps:$4 sm:$0xff]  }
 0x1e8   : > { %4645 = vmatpush2.bf16.msra.mxu0 %v6557_v29  ;;  %v6626_v29 = vld [vmem:[#allocation7 + $0x8e8] ss:$12 sps:$4 sm:$0xff]  }
 0x1e9   : > { %4686 = vmatpush2.bf16.msra.mxu1 %v6560_v31  ;;  %4646 = vmatprep.subr.bf16.mxu0 %v6565_v32  ;;  %v6634_v31 = vld [vmem:[#allocation7 + $0x8d4] ss:$12 sps:$4 sm:$0xff]  }
 0x1ea   : > { %4687 = vmatprep.subr.bf16.mxu1 %v6568_v34 }
 0x1ec   : > { %4647 = vmatpush2.bf16.msra.mxu0 %v6563_v42  ;;  %v6625_v42 = vld [vmem:[#allocation7 + $0x73c] ss:$12 sps:$4 sm:$0xff]  }
 0x1ed   : > { %4688 = vmatpush2.bf16.msra.mxu1 %v6566_v9  ;;  %4698 = vmatprep.subr.bf16.mxu0 %v6571_v35  ;;  %v6640_v35 = vld [vmem:[#allocation7 + $0x8bc] ss:$12 sps:$4 sm:$0xff]  }
 0x1ee   : > { %4739 = vmatprep.subr.bf16.mxu1 %v6580_v38 }
 0x1ef   : > { %4649 = vmatmul.mubr.bf16.vlgmr.msra.gmra.mxu0 %v7215_v40 }
 0x1f0   : > { %v7219_v46 = vpop.f32.mrf.mxu1  ;;  %4690 = vmatmul.mubr.bf16.vlgmr.msra.gmra.mxu1 %v7217_v44  ;;  %4699 = vmatpush1.bf16.msra.mxu0 %v6569_v6  ;;  %v6623_v6 = vld [vmem:[#allocation7 + $0x738] ss:$12 sps:$4 sm:$0xff]  }
 0x1f1   : > { %4700 = vmatprep.subr.bf16.mxu0 %v6574_v41  ;;  %4740 = vmatpush1.bf16.msra.mxu1 %v6578_v43  ;;  %v6631_v43 = vld [vmem:[#allocation7 + $0x724] ss:$12 sps:$4 sm:$0xff]  }
 0x1f2   : > { %v7223_v19 = vpop.f32.mrf.mxu1  ;;  %4741 = vmatprep.subr.bf16.mxu1 %v6586_v45  ;;  %v6638_v45 = vld [vmem:[#allocation7 + $0x8b8] ss:$12 sps:$4 sm:$0xff]  }
 0x1f4   : > { %v2488_v52 = vpop.f32.mrf.mxu1  ;;  %4701 = vmatpush1.bf16.msra.mxu0 %v6572_v47 }
 0x1f5   : > { %4702 = vmatprep.subr.bf16.mxu0 %v6577_v48  ;;  %4742 = vmatpush1.bf16.msra.mxu1 %v6584_v50  ;;  %v6646_v48 = vld [vmem:[#allocation7 + $0x8a4] ss:$12 sps:$4 sm:$0xff]   ;;  %v6637_v52 = vld [vmem:[#allocation7 + $0x70c] ss:$12 sps:$4 sm:$0xff]  }
 0x1f6   : > { %v2489_v56 = vpop.f32.mrf.mxu1  ;;  %4743 = vmatprep.subr.bf16.mxu1 %v6592_v51  ;;  %v6629_v51 = vld [vmem:[#allocation7 + $0x720] ss:$12 sps:$4 sm:$0xff]  }
 0x1f7   : > { %v6635_v56 = vld [vmem:[#allocation7 + $0x708] ss:$12 sps:$4 sm:$0xff]  }
 0x1f8   : > { %4703 = vmatpush1.bf16.msra.mxu0 %v6575_v55  ;;  %v6644_v55 = vld [vmem:[#allocation7 + $0x8a0] ss:$12 sps:$4 sm:$0xff]  }
 0x1f9   : > { %4704 = vmatprep.subr.bf16.mxu0 %v6583_v57  ;;  %4744 = vmatpush1.bf16.msra.mxu1 %v6590_v58  ;;  %v616_v57 = vrot.slane %v7228_v27, %v7144_v26  ;;  %v6643_v58 = vld [vmem:[#allocation7 + $0x6f4] ss:$12 sps:$4 sm:$0xff]  }
 0x1fa   : > { %4745 = vmatprep.subr.bf16.mxu1 %v6598_v59  ;;  %v6650_v59 = vld [vmem:[#allocation7 + $0x888] ss:$12 sps:$4 sm:$0xff]  }
 0x1fc   : > { %4705 = vmatpush1.bf16.msra.mxu0 %v6581_v61  ;;  %v6658_v61 = vld [vmem:[#allocation7 + $0x874] ss:$12 sps:$4 sm:$0xff]  }
 0x1fd   : > { %4706 = vmatprep.subr.bf16.mxu0 %v6589_v62  ;;  %4746 = vmatpush1.bf16.msra.mxu1 %v6596_v63  ;;  %v6641_v62 = vld [vmem:[#allocation7 + $0x6f0] ss:$12 sps:$4 sm:$0xff]  }
 0x1fe   : > { %4747 = vmatprep.subr.bf16.mxu1 %v6604_v1  ;;  %v6649_v1 = vld [vmem:[#allocation7 + $0x6dc] ss:$12 sps:$4 sm:$0xff]  }
 0x200   : > { %4707 = vmatpush1.bf16.msra.mxu0 %v6587_v2  ;;  %v6656_v2 = vld [vmem:[#allocation7 + $0x870] ss:$12 sps:$4 sm:$0xff]  }
 0x201   : > { %4708 = vmatprep.subr.bf16.mxu0 %v6595_v25  ;;  %4748 = vmatpush1.bf16.msra.mxu1 %v6602_v3  ;;  %v6663_v25 = vld [vmem:[#allocation7 + $0x85c] ss:$12 sps:$4 sm:$0xff]   ;;  %v6647_v3 = vld [vmem:[#allocation7 + $0x6d8] ss:$12 sps:$4 sm:$0xff]  }
 0x202   : > { %4749 = vmatprep.subr.bf16.mxu1 %v6610_v4 }
 0x204   : > { %4709 = vmatpush1.bf16.msra.mxu0 %v6593_v7  ;;  %v6655_v7 = vld [vmem:[#allocation7 + $0x6c4] ss:$12 sps:$4 sm:$0xff]  }
 0x205   : > { %4710 = vmatprep.subr.bf16.mxu0 %v6601_v10  ;;  %4750 = vmatpush1.bf16.msra.mxu1 %v6608_v53  ;;  %v6661_v10 = vld [vmem:[#allocation7 + $0x858] ss:$12 sps:$4 sm:$0xff]  }
 0x206   : > { %4751 = vmatprep.subr.bf16.mxu1 %v6616_v11  ;;  %v6668_v53 = vld [vmem:[#allocation7 + $0x844] ss:$12 sps:$4 sm:$0xff]   ;;  %v6653_v11 = vld [vmem:[#allocation7 + $0x6c0] ss:$12 sps:$4 sm:$0xff]  }
 0x208   : > { %4711 = vmatpush1.bf16.msra.mxu0 %v6599_v14 }
 0x209   : > { %4712 = vmatprep.subr.bf16.mxu0 %v6607_v8  ;;  %4752 = vmatpush1.bf16.msra.mxu1 %v6614_v15  ;;  %v6659_v8 = vld [vmem:[#allocation7 + $0x170] ss:$12 sps:$4 sm:$0xff]   ;;  %v6666_v15 = vld [vmem:[#allocation7 + $0x840] ss:$12 sps:$4 sm:$0xff]  }
 0x20a   : > { %4753 = vmatprep.subr.bf16.mxu1 %v6622_v60  ;;  %v6671_v60 = vld [vmem:[#allocation7 + $0x2f0] ss:$12 sps:$4 sm:$0xff]  }
 0x20c   : > { %4713 = vmatpush1.bf16.msra.mxu0 %v6605_v17  ;;  %v624_v17 = vrot.slane %v7228_v27, %v7176_v49 }
 0x20d   : > { %4714 = vmatprep.subr.bf16.mxu0 %v6613_v18  ;;  %4754 = vmatpush1.bf16.msra.mxu1 %v6620_v22  ;;  %v6664_v22 = vld [vmem:[#allocation7 + $0x158] ss:$12 sps:$4 sm:$0xff]  }
 0x20e   : > { %4755 = vmatprep.subr.bf16.mxu1 %v6628_v23  ;;  %v628_v23 = vrot.slane %v7228_v27, %v595_v13  ;;  %v6670_v13 = vld [vmem:[#allocation7 + $0x80] ss:$12 sps:$4 sm:$0xff]  }
 0x20f   : > { %v2443_v32 = vpop.f32.mrf.mxu0 }
 0x210   : > { %4715 = vmatpush2.bf16.msra.mxu0 %v6611_v24  ;;  %v2444_v63 = vadd.f32 %v2443_v32, %v616_v57  ;;  %v6682_v57 = vld [vmem:[#allocation7 + $0x38] ss:$12 sps:$4 sm:$0xff]  }
 0x211   : > { %v2445_v34 = vpop.f32.mrf.mxu0  ;;  %4716 = vmatprep.subr.bf16.mxu0 %v6619_v28  ;;  %4756 = vmatpush2.bf16.msra.mxu1 %v6626_v29 }
 0x212   : > { %v2446_v9 = vadd.f32 %v2445_v34, %v620_v30  ;;  %4757 = vmatprep.subr.bf16.mxu1 %v6634_v31  ;;  %v2485_v4 = vadd.f32 %v7219_v46, %v2444_v63  ;;  %v6660_v46 = vld [vmem:[#allocation7 + $0xb0] ss:$12 sps:$4 sm:$0xff]   ;;  %v6665_v30 = vld [vmem:[#allocation7 + $0x98] ss:$12 sps:$4 sm:$0xff]  }
 0x213   : > { %v2447_v37 = vpop.f32.mrf.mxu0  ;;  %v6687_v63 = vld [vmem:[#allocation7 + $0x290] ss:$12 sps:$4 sm:$0xff]  }
 0x214   : > { %v2487_v38 = vadd.f32 %v7223_v19, %v2446_v9  ;;  %4717 = vmatpush2.bf16.msra.mxu0 %v6617_v33  ;;  %v6652_v19 = vld [vmem:[#allocation7 + $0x88c] ss:$12 sps:$4 sm:$0xff]   ;;  %v2581_v14 = vmax.f32 %v2485_v4, 0.0 }
 0x215   : > { %v2448_v41 = vpop.f32.mrf.mxu0  ;;  %4718 = vmatprep.subr.bf16.mxu0 %v6625_v42  ;;  %4758 = vmatpush2.bf16.msra.mxu1 %v6632_v36  ;;  %v6669_v33 = vld [vmem:[#allocation7 + $0x140] ss:$12 sps:$4 sm:$0xff]   ;;  %v6692_v4 = vld [vmem:[#allocation7 + $0x1b8] ss:$12 sps:$4 sm:$0xff]  }
 0x216   : > { %v2582_v47 = vmax.f32 %v2487_v38, 0.0  ;;  %4759 = vmatprep.subr.bf16.mxu1 %v6640_v35  ;;  %v7241_v18 = vpack.c.bf16 %v2581_v14, %v2581_v14  ;;  %v6672_v38 = vld [vmem:[#allocation7 + $0x128] ss:$12 sps:$4 sm:$0xff]   ;;  %v6698_v14 = vld [vmem:[#allocation7 + $0x398] ss:$12 sps:$4 sm:$0xff]  }
 0x218   : > { %v7233_v50 = vpack.c.bf16 %v2582_v47, %v2582_v47  ;;  %4719 = vmatpush2.bf16.msra.mxu0 %v6623_v6  ;;  %v6675_v47 = vld [vmem:[#allocation7 + $0x2d8] ss:$12 sps:$4 sm:$0xff]  }
 0x219   : > { %4720 = vmatprep.subr.bf16.mxu0 %v6631_v43  ;;  %4760 = vmatpush2.bf16.msra.mxu1 %v6638_v45  ;;  %v6674_v43 = vld [vmem:[#allocation7 + $0x68] ss:$12 sps:$4 sm:$0xff]  }
 0x21a   : > { %4730 = vmatprep.mubr.bf16.mxu0 %v7233_v50  ;;  %4761 = vmatprep.subr.bf16.mxu1 %v6646_v48  ;;  %v6676_v48 = vld [vmem:[#allocation7 + $0x110] ss:$12 sps:$4 sm:$0xff]  }
 0x21c   : > { %4721 = vmatpush2.bf16.msra.mxu0 %v6629_v51  ;;  %v6677_v51 = vld [vmem:[#allocation7 + $0x218] ss:$12 sps:$4 sm:$0xff]  }
 0x21d   : > { %4722 = vmatprep.subr.bf16.mxu0 %v6637_v52  ;;  %4762 = vmatpush2.bf16.msra.mxu1 %v6644_v55  ;;  %v6678_v52 = vld [vmem:[#allocation7 + $0x50] ss:$12 sps:$4 sm:$0xff]   ;;  %v6679_v55 = vld [vmem:[#allocation7 + $0x2c0] ss:$12 sps:$4 sm:$0xff]  }
 0x21e   : > { %4763 = vmatprep.subr.bf16.mxu1 %v6652_v19  ;;  %v6680_v19 = vld [vmem:[#allocation7 + $0xf8] ss:$12 sps:$4 sm:$0xff]  }
 0x220   : > { %4723 = vmatpush2.bf16.msra.mxu0 %v6635_v56  ;;  %v6681_v56 = vld [vmem:[#allocation7 + $0x200] ss:$12 sps:$4 sm:$0xff]  }
 0x221   : > { %4724 = vmatprep.subr.bf16.mxu0 %v6643_v58  ;;  %4764 = vmatpush2.bf16.msra.mxu1 %v6650_v59  ;;  %v6683_v58 = vld [vmem:[#allocation7 + $0x2a8] ss:$12 sps:$4 sm:$0xff]   ;;  %v6684_v59 = vld [vmem:[#allocation7 + $0xe0] ss:$12 sps:$4 sm:$0xff]  }
 0x222   : > { %4765 = vmatprep.subr.bf16.mxu1 %v6658_v61  ;;  %v6685_v61 = vld [vmem:[#allocation7 + $0x1e8] ss:$12 sps:$4 sm:$0xff]  }
 0x224   : > { %4725 = vmatpush2.bf16.msra.mxu0 %v6641_v62  ;;  %v6686_v62 = vld [vmem:[#allocation7 + $0x20] ss:$12 sps:$4 sm:$0xff]  }
 0x225   : > { %4726 = vmatprep.subr.bf16.mxu0 %v6649_v1  ;;  %4766 = vmatpush2.bf16.msra.mxu1 %v6656_v2  ;;  %v6689_v1 = vld [vmem:[#allocation7 + $0x1d0] ss:$12 sps:$4 sm:$0xff]   ;;  %v6690_v2 = vld [vmem:[#allocation7 + $0x8] ss:$12 sps:$4 sm:$0xff]  }
 0x226   : > { %4767 = vmatprep.subr.bf16.mxu1 %v6663_v25  ;;  %v6691_v25 = vld [vmem:[#allocation7 + $0x278] ss:$12 sps:$4 sm:$0xff]  }
 0x228   : > { %4727 = vmatpush2.bf16.msra.mxu0 %v6647_v3  ;;  %v6693_v3 = vld [vmem:[#allocation7 + $0x470] ss:$12 sps:$4 sm:$0xff]  }
 0x229   : > { %4728 = vmatprep.subr.bf16.mxu0 %v6655_v7  ;;  %4768 = vmatpush2.bf16.msra.mxu1 %v6661_v10  ;;  %v6694_v7 = vld [vmem:[#allocation7 + $0x3b0] ss:$12 sps:$4 sm:$0xff]   ;;  %v6695_v10 = vld [vmem:[#allocation7 + $0x260] ss:$12 sps:$4 sm:$0xff]  }
 0x22a   : > { %4769 = vmatprep.subr.bf16.mxu1 %v6668_v53  ;;  %v6697_v53 = vld [vmem:[#allocation7 + $0x458] ss:$12 sps:$4 sm:$0xff]  }
 0x22c   : > { %4729 = vmatpush2.bf16.msra.mxu0 %v6653_v11  ;;  %v6696_v11 = vld [vmem:[#allocation7 + $0x1a0] ss:$12 sps:$4 sm:$0xff]  }
 0x22d   : > { %5721 = vmatprep.subr.bf16.mxu0 %v6659_v8  ;;  %4770 = vmatpush2.bf16.msra.mxu1 %v6666_v15  ;;  %v6699_v8 = vld [vmem:[#allocation7 + $0x248] ss:$12 sps:$4 sm:$0xff]   ;;  %v6701_v15 = vld [vmem:[#allocation7 + $0x440] ss:$12 sps:$4 sm:$0xff]  }
 0x22e   : > { %5743 = vmatprep.subr.bf16.mxu1 %v6671_v60  ;;  %v6700_v60 = vld [vmem:[#allocation7 + $0x188] ss:$12 sps:$4 sm:$0xff]  }
 0x22f   : > { %v2566_v28 = vpop.f32.mrf.mxu0  ;;  %4731 = vmatmul.mubr.bf16.vlgmr.msra.gmra.mxu0 %v7241_v18 }
 0x230   : > { %v2525_v24 = vpop.f32.mrf.mxu1  ;;  %5722 = vmatpush3.bf16.msra.mxu0 %v6660_v46  ;;  %4812 = vmatprep.mubr.bf16.mxu0 %v7160_v16  ;;  %v6673_v16 = vld [vmem:[#allocation7 + $0x230] ss:$12 sps:$4 sm:$0xff]  }
 0x231   : > { %v2526_v29 = vadd.f32 %v2525_v24, %v624_v17  ;;  %v2568_v32 = vpop.f32.mrf.mxu0  ;;  %5723 = vmatprep.subr.bf16.mxu0 %v6664_v22  ;;  %v6702_v17 = vld [vmem:[#allocation7 + $0x380] ss:$12 sps:$4 sm:$0xff]   ;;  %v6703_v46 = vld [vmem:[#allocation7 + $0x5f0] ss:$12 sps:$4 sm:$0xff]   ;;  %v6704_v22 = vld [vmem:[#allocation7 + $0x428] ss:$12 sps:$4 sm:$0xff]  }
 0x232   : > { %v2527_v31 = vpop.f32.mrf.mxu1  ;;  %v6707_v24 = vld [vmem:[#allocation7 + $0x5d8] ss:$12 sps:$4 sm:$0xff]  }
 0x233   : > { %v2567_v34 = vadd.f32 %v2566_v28, %v2526_v29  ;;  %v2528_v42 = vadd.f32 %v2527_v31, %v628_v23  ;;  %v2570_v21 = vpop.f32.mrf.mxu0  ;;  %v6706_v23 = vld [vmem:[#allocation7 + $0x368] ss:$12 sps:$4 sm:$0xff]   ;;  %v6709_v28 = vld [vmem:[#allocation7 + $0x518] ss:$12 sps:$4 sm:$0xff]   ;;  %v6710_v29 = vld [vmem:[#allocation7 + $0x350] ss:$12 sps:$4 sm:$0xff]  }
 0x234   : > { %v2529_v36 = vpop.f32.mrf.mxu1  ;;  %5724 = vmatpush3.bf16.msra.mxu0 %v6665_v30  ;;  %v6711_v30 = vld [vmem:[#allocation7 + $0x5c0] ss:$12 sps:$4 sm:$0xff]   ;;  %v6712_v31 = vld [vmem:[#allocation7 + $0x3f8] ss:$12 sps:$4 sm:$0xff]   ;;  %v6720_v21 = vld [vmem:[#allocation7 + $0x3c8] ss:$12 sps:$4 sm:$0xff]  }
 0x235   : > { %v2569_v9 = vadd.f32 %v2568_v32, %v2528_v42  ;;  %v2583_v27 = vmax.f32 %v2567_v34, 0.0  ;;  %v2571_v37 = vpop.f32.mrf.mxu0  ;;  %5725 = vmatprep.subr.bf16.mxu0 %v6669_v33  ;;  %v6713_v32 = vld [vmem:[#allocation7 + $0x500] ss:$12 sps:$4 sm:$0xff]   ;;  %v6714_v33 = vld [vmem:[#allocation7 + $0x338] ss:$12 sps:$4 sm:$0xff]  }
 0x236   : > { %v2530_v35 = vpop.f32.mrf.mxu1  ;;  %v6715_v34 = vld [vmem:[#allocation7 + $0x5a8] ss:$12 sps:$4 sm:$0xff]   ;;  %v6716_v42 = vld [vmem:[#allocation7 + $0x3e0] ss:$12 sps:$4 sm:$0xff]   ;;  %v6719_v36 = vld [vmem:[#allocation7 + $0x590] ss:$12 sps:$4 sm:$0xff]  }
 0x237   : > { %v2584_v6 = vmax.f32 %v2569_v9, 0.0  ;;  %v7250_v45 = vpack.c.bf16 %v2583_v27, %v2583_v27  ;;  %v6721_v9 = vld [vmem:[#allocation7 + $0x4d0] ss:$12 sps:$4 sm:$0xff]   ;;  %v6723_v27 = vld [vmem:[#allocation7 + $0x578] ss:$12 sps:$4 sm:$0xff]  }
 0x238   : > { %5726 = vmatpush3.bf16.msra.mxu0 %v6670_v13  ;;  %v6722_v13 = vld [vmem:[#allocation7 + $0x308] ss:$12 sps:$4 sm:$0xff]   ;;  %v7262_v35 = vld [vmem:[%s7340_s4] sm:$0x7] }
 0x239   : > { %v7248_v41 = vpack.c.bf16 %v2584_v6, %v2584_v6  ;;  %5727 = vmatprep.subr.bf16.mxu0 %v6672_v38  ;;  %v6725_v37 = vld [vmem:[#allocation7 + $0x770] ss:$12 sps:$4 sm:$0xff]   ;;  %v2986_v38 = vrot.slane %v7262_v35, %v7144_v26  ;;  %v6724_v6 = vld [vmem:[#allocation7 + $0x4b8] ss:$12 sps:$4 sm:$0xff]  }
 0x23b   : > { %4771 = vmatprep.mubr.bf16.mxu1 %v7248_v41 }
 0x23c   : > { %4772 = vmatmul.mubr.bf16.vlgmr.msra.gmra.mxu1 %v7250_v45  ;;  %5728 = vmatpush3.bf16.msra.mxu0 %v6674_v43  ;;  %v2990_v43 = vrot.slane %v7262_v35, %v7154_v54  ;;  %v6733_v54 = vld [vmem:[#allocation7 + $0x740] ss:$12 sps:$4 sm:$0xff]  }
 0x23d   : > { %5744 = vmatpush3.bf16.msra.mxu1 %v6673_v16  ;;  %4852 = vmatprep.mubr.bf16.mxu1 %v7172_v39  ;;  %v6688_v39 = vld [vmem:[#allocation7 + $0xc8] ss:$12 sps:$4 sm:$0xff]   ;;  %v6726_v16 = vld [vmem:[#allocation7 + $0x6b0] ss:$12 sps:$4 sm:$0xff]  }
 0x23e   : > { %5745 = vmatprep.subr.bf16.mxu1 %v6675_v47  ;;  %5729 = vmatprep.subr.bf16.mxu0 %v6676_v48  ;;  %v6727_v47 = vld [vmem:[#allocation7 + $0x560] ss:$12 sps:$4 sm:$0xff]   ;;  %v6729_v48 = vld [vmem:[#allocation7 + $0x758] ss:$12 sps:$4 sm:$0xff]  }
 0x240   : > { %5730 = vmatpush3.bf16.msra.mxu0 %v6678_v52 }
 0x241   : > { %5746 = vmatpush3.bf16.msra.mxu1 %v6677_v51  ;;  %5731 = vmatprep.subr.bf16.mxu0 %v6680_v19  ;;  %v6728_v19 = vld [vmem:[#allocation7 + $0x4a0] ss:$12 sps:$4 sm:$0xff]  }
 0x242   : > { %5747 = vmatprep.subr.bf16.mxu1 %v6679_v55 }
 0x244   : > { %5732 = vmatpush3.bf16.msra.mxu0 %v6682_v57  ;;  %v6731_v57 = vld [vmem:[#allocation7 + $0x548] ss:$12 sps:$4 sm:$0xff]  }
 0x245   : > { %5748 = vmatpush3.bf16.msra.mxu1 %v6681_v56  ;;  %5733 = vmatprep.subr.bf16.mxu0 %v6684_v59  ;;  %v6730_v56 = vld [vmem:[#allocation7 + $0x698] ss:$12 sps:$4 sm:$0xff]  }
 0x246   : > { %5749 = vmatprep.subr.bf16.mxu1 %v6683_v58 }
 0x248   : > { %5734 = vmatpush3.bf16.msra.mxu0 %v6686_v62 }
 0x249   : > { %5750 = vmatpush3.bf16.msra.mxu1 %v6685_v61  ;;  %5735 = vmatprep.subr.bf16.mxu0 %v6688_v39 }
 0x24a   : > { %5751 = vmatprep.subr.bf16.mxu1 %v6687_v63 }
 0x24c   : > { %5736 = vmatpush3.bf16.msra.mxu0 %v6690_v2  ;;  %v6735_v2 = vld [vmem:[#allocation7 + $0x8f0] ss:$12 sps:$4 sm:$0xff]  }
 0x24d   : > { %5752 = vmatpush3.bf16.msra.mxu1 %v6689_v1  ;;  %5765 = vmatprep.subr.bf16.mxu0 %v6693_v3  ;;  %v6736_v3 = vld [vmem:[#allocation7 + $0x728] ss:$12 sps:$4 sm:$0xff]  }
 0x24e   : > { %5753 = vmatprep.subr.bf16.mxu1 %v6691_v25 }
 0x24f   : > { %4813 = vmatmul.mubr.bf16.vlgmr.msra.gmra.mxu0 %v7188_v20  ;;  %v6705_v20 = vld [vmem:[#allocation7 + $0x530] ss:$12 sps:$4 sm:$0xff]  }
 0x250   : > { %5766 = vmatpush3.bf16.msra.mxu0 %v6694_v7  ;;  %4892 = vmatprep.mubr.bf16.mxu0 %v7198_v12  ;;  %v6708_v12 = vld [vmem:[#allocation7 + $0x410] ss:$12 sps:$4 sm:$0xff]   ;;  %v6738_v7 = vld [vmem:[#allocation7 + $0x668] ss:$12 sps:$4 sm:$0xff]  }
 0x251   : > { %5754 = vmatpush3.bf16.msra.mxu1 %v6692_v4  ;;  %5767 = vmatprep.subr.bf16.mxu0 %v6697_v53  ;;  %v6737_v4 = vld [vmem:[#allocation7 + $0x830] ss:$12 sps:$4 sm:$0xff]  }
 0x252   : > { %5755 = vmatprep.subr.bf16.mxu1 %v6695_v10  ;;  %v6739_v10 = vld [vmem:[#allocation7 + $0x8d8] ss:$12 sps:$4 sm:$0xff]   ;;  %v6740_v53 = vld [vmem:[#allocation7 + $0x710] ss:$12 sps:$4 sm:$0xff]  }
 0x254   : > { %5768 = vmatpush3.bf16.msra.mxu0 %v6698_v14  ;;  %v6742_v14 = vld [vmem:[#allocation7 + $0x650] ss:$12 sps:$4 sm:$0xff]  }
 0x255   : > { %5756 = vmatpush3.bf16.msra.mxu1 %v6696_v11  ;;  %5769 = vmatprep.subr.bf16.mxu0 %v6701_v15  ;;  %v6741_v11 = vld [vmem:[#allocation7 + $0x818] ss:$12 sps:$4 sm:$0xff]  }
 0x256   : > { %5757 = vmatprep.subr.bf16.mxu1 %v6699_v8  ;;  %v6743_v8 = vld [vmem:[#allocation7 + $0x8c0] ss:$12 sps:$4 sm:$0xff]   ;;  %v6744_v15 = vld [vmem:[#allocation7 + $0x6f8] ss:$12 sps:$4 sm:$0xff]  }
 0x258   : > { %5770 = vmatpush3.bf16.msra.mxu0 %v6702_v17  ;;  %v6746_v17 = vld [vmem:[#allocation7 + $0x638] ss:$12 sps:$4 sm:$0xff]  }
 0x259   : > { %5758 = vmatpush3.bf16.msra.mxu1 %v6700_v60  ;;  %5771 = vmatprep.subr.bf16.mxu0 %v6704_v22  ;;  %v6745_v60 = vld [vmem:[#allocation7 + $0x800] ss:$12 sps:$4 sm:$0xff]  }
 0x25a   : > { %5787 = vmatprep.subr.bf16.mxu1 %v6703_v46  ;;  %v6747_v46 = vld [vmem:[#allocation7 + $0x8a8] ss:$12 sps:$4 sm:$0xff]   ;;  %v6748_v22 = vld [vmem:[#allocation7 + $0x6e0] ss:$12 sps:$4 sm:$0xff]  }
 0x25c   : > { %4853 = vmatmul.mubr.bf16.vlgmr.msra.gmra.mxu1 %v7190_v0  ;;  %5772 = vmatpush3.bf16.msra.mxu0 %v6706_v23  ;;  %v6717_v0 = vld [vmem:[#allocation7 + $0x4e8] ss:$12 sps:$4 sm:$0xff]  }
 0x25d   : > { %5788 = vmatpush3.bf16.msra.mxu1 %v6705_v20  ;;  %4932 = vmatprep.mubr.bf16.mxu1 %v7208_v5  ;;  %v6718_v5 = vld [vmem:[#allocation7 + $0x320] ss:$12 sps:$4 sm:$0xff]   ;;  %v6751_v20 = vld [vmem:[#allocation7 + $0x890] ss:$12 sps:$4 sm:$0xff]   ;;  %v6752_v23 = vld [vmem:[#allocation7 + $0x6c8] ss:$12 sps:$4 sm:$0xff]  }
 0x25e   : > { %5789 = vmatprep.subr.bf16.mxu1 %v6707_v24  ;;  %5773 = vmatprep.subr.bf16.mxu0 %v6708_v12  ;;  %v6753_v24 = vld [vmem:[#allocation7 + $0x7d0] ss:$12 sps:$4 sm:$0xff]   ;;  %v6754_v12 = vld [vmem:[#allocation7 + $0x608] ss:$12 sps:$4 sm:$0xff]  }
 0x260   : > { %5774 = vmatpush3.bf16.msra.mxu0 %v6710_v29  ;;  %v6756_v29 = vld [vmem:[#allocation7 + $0x7b8] ss:$12 sps:$4 sm:$0xff]  }
 0x261   : > { %5790 = vmatpush3.bf16.msra.mxu1 %v6709_v28  ;;  %5775 = vmatprep.subr.bf16.mxu0 %v6712_v31  ;;  %v6755_v28 = vld [vmem:[#allocation7 + $0x878] ss:$12 sps:$4 sm:$0xff]   ;;  %v6758_v31 = vld [vmem:[#allocation7 + $0x7a0] ss:$12 sps:$4 sm:$0xff]  }
 0x262   : > { %5791 = vmatprep.subr.bf16.mxu1 %v6711_v30  ;;  %v6757_v30 = vld [vmem:[#allocation7 + $0x860] ss:$12 sps:$4 sm:$0xff]  }
 0x264   : > { %5776 = vmatpush3.bf16.msra.mxu0 %v6714_v33  ;;  %v6760_v33 = vld [vmem:[#allocation7 + $0x788] ss:$12 sps:$4 sm:$0xff]  }
 0x265   : > { %5792 = vmatpush3.bf16.msra.mxu1 %v6713_v32  ;;  %5777 = vmatprep.subr.bf16.mxu0 %v6716_v42  ;;  %v6759_v32 = vld [vmem:[#allocation7 + $0x848] ss:$12 sps:$4 sm:$0xff]  }
 0x266   : > { %5793 = vmatprep.subr.bf16.mxu1 %v6715_v34 }
 0x268   : > { %5778 = vmatpush3.bf16.msra.mxu0 %v6718_v5 }
 0x269   : > { %5794 = vmatpush3.bf16.msra.mxu1 %v6717_v0  ;;  %5779 = vmatprep.subr.bf16.mxu0 %v6720_v21 }
 0x26a   : > { %5795 = vmatprep.subr.bf16.mxu1 %v6719_v36 }
 0x26c   : > { %5780 = vmatpush3.bf16.msra.mxu0 %v6722_v13 }
 0x26d   : > { %5796 = vmatpush3.bf16.msra.mxu1 %v6721_v9  ;;  %5809 = vmatprep.subr.bf16.mxu0 %v6725_v37 }
 0x26e   : > { %5797 = vmatprep.subr.bf16.mxu1 %v6723_v27 }
 0x26f   : > { %v4568_v51 = vpop.f32.mrf.mxu0  ;;  %4893 = vmatmul.mubr.bf16.vlgmr.msra.gmra.mxu0 %v7215_v40  ;;  %v6732_v40 = vld [vmem:[#allocation7 + $0x488] ss:$12 sps:$4 sm:$0xff]  }
 0x270   : > { %v4569_v52 = vadd.f32 %v4568_v51, %v2986_v38  ;;  %v4609_v55 = vpop.f32.mrf.mxu1  ;;  %5810 = vmatpush3.bf16.msra.mxu0 %v6726_v16  ;;  %4972 = vmatprep.mubr.bf16.mxu0 %v7233_v50  ;;  %v6734_v50 = vld [vmem:[#allocation7 + $0x680] ss:$12 sps:$4 sm:$0xff]  }
 0x271   : > { %5798 = vmatpush3.bf16.msra.mxu1 %v6724_v6  ;;  %v4570_v26 = vpop.f32.mrf.mxu0  ;;  %5811 = vmatprep.subr.bf16.mxu0 %v6729_v48 }
 0x272   : > { %v7270_v58 = vadd.f32 %v4609_v55, %v4569_v52  ;;  %v4571_v59 = vadd.f32 %v4570_v26, %v2990_v43  ;;  %v4611_v61 = vpop.f32.mrf.mxu1  ;;  %5799 = vmatprep.subr.bf16.mxu1 %v6727_v47 }
 0x273   : > { %v4572_v62 = vpop.f32.mrf.mxu0 }
 0x274   : > { %v7272_v63 = vadd.f32 %v4611_v61, %v4571_v59  ;;  %v4613_v39 = vpop.f32.mrf.mxu1  ;;  %5812 = vmatpush3.bf16.msra.mxu0 %v6730_v56 }
 0x275   : > { %5800 = vmatpush3.bf16.msra.mxu1 %v6728_v19  ;;  %v4573_v1 = vpop.f32.mrf.mxu0  ;;  %5813 = vmatprep.subr.bf16.mxu0 %v6733_v54 }
 0x276   : > { %5801 = vmatprep.subr.bf16.mxu1 %v6731_v57  ;;  %v4614_v25 = vpop.f32.mrf.mxu1 }
 0x278   : > { %5814 = vmatpush3.bf16.msra.mxu0 %v6734_v50 }
 0x279   : > { %5802 = vmatpush3.bf16.msra.mxu1 %v6732_v40  ;;  %5815 = vmatprep.subr.bf16.mxu0 %v6736_v3 }
 0x27a   : > { %5831 = vmatprep.subr.bf16.mxu1 %v6735_v2 }
 0x27c   : > { %4933 = vmatmul.mubr.bf16.vlgmr.msra.gmra.mxu1 %v7217_v44  ;;  %5816 = vmatpush3.bf16.msra.mxu0 %v6738_v7  ;;  %v6749_v44 = vld [vmem:[#allocation7 + $0x7e8] ss:$12 sps:$4 sm:$0xff]  }
 0x27d   : > { %5832 = vmatpush3.bf16.msra.mxu1 %v6737_v4  ;;  %5012 = vmatprep.mubr.bf16.mxu1 %v7248_v41  ;;  %v6750_v41 = vld [vmem:[#allocation7 + $0x620] ss:$12 sps:$4 sm:$0xff]  }
 0x27e   : > { %5833 = vmatprep.subr.bf16.mxu1 %v6739_v10  ;;  %5817 = vmatprep.subr.bf16.mxu0 %v6740_v53 }
 0x280   : > { %5818 = vmatpush3.bf16.msra.mxu0 %v6742_v14 }
 0x281   : > { %5834 = vmatpush3.bf16.msra.mxu1 %v6741_v11  ;;  %5819 = vmatprep.subr.bf16.mxu0 %v6744_v15  ;;  %v2994_v11 = vrot.slane %v7262_v35, %v7176_v49 }
 0x282   : > { %5835 = vmatprep.subr.bf16.mxu1 %v6743_v8 }
 0x284   : > { %5820 = vmatpush3.bf16.msra.mxu0 %v6746_v17 }
 0x285   : > { %5836 = vmatpush3.bf16.msra.mxu1 %v6745_v60  ;;  %5821 = vmatprep.subr.bf16.mxu0 %v6748_v22 }
 0x286   : > { %5837 = vmatprep.subr.bf16.mxu1 %v6747_v46 }
 0x288   : > { %5822 = vmatpush3.bf16.msra.mxu0 %v6750_v41 }
 0x289   : > { %5838 = vmatpush3.bf16.msra.mxu1 %v6749_v44  ;;  %5823 = vmatprep.subr.bf16.mxu0 %v6752_v23 }
 0x28a   : > { %5839 = vmatprep.subr.bf16.mxu1 %v6751_v20 }
 0x28c   : > { %5824 = vmatpush3.bf16.msra.mxu0 %v6754_v12 }
 0x28d   : > { %5840 = vmatpush3.bf16.msra.mxu1 %v6753_v24 }
 0x28e   : > { %5841 = vmatprep.subr.bf16.mxu1 %v6755_v28 }
 0x28f   : > { %4973 = vmatmul.mubr.bf16.vlgmr.msra.gmra.mxu0 %v7241_v18 }
 0x291   : > { %5842 = vmatpush3.bf16.msra.mxu1 %v6756_v29 }
 0x292   : > { %5843 = vmatprep.subr.bf16.mxu1 %v6757_v30 }
 0x295   : > { %5844 = vmatpush3.bf16.msra.mxu1 %v6758_v31 }
 0x296   : > { %5845 = vmatprep.subr.bf16.mxu1 %v6759_v32 }
 0x299   : > { %5846 = vmatpush3.bf16.msra.mxu1 %v6760_v33 }
 0x29c   : > { %5013 = vmatmul.mubr.bf16.vlgmr.msra.gmra.mxu1 %v7250_v45 }
 0x2af   : > { %v4650_v34 = vpop.f32.mrf.mxu0 }
 0x2b0   : > { %v4651_v42 = vadd.f32 %v4650_v34, %v7270_v58  ;;  %v4691_v0 = vpop.f32.mrf.mxu1 }
 0x2b1   : > { %v4652_v5 = vpop.f32.mrf.mxu0 }
 0x2b2   : > { %v4692_v36 = vadd.f32 %v4691_v0, %v4651_v42  ;;  %v4653_v21 = vadd.f32 %v4652_v5, %v7272_v63  ;;  %v4693_v18 = vpop.f32.mrf.mxu1 }
 0x2b3   : > { %v4654_v9 = vpop.f32.mrf.mxu0 }
 0x2b4   : > { %v4694_v13 = vadd.f32 %v4693_v18, %v4653_v21  ;;  %v4695_v27 = vpop.f32.mrf.mxu1 }
 0x2b5   : > { %v4655_v37 = vpop.f32.mrf.mxu0 }
 0x2b6   : > { %v4696_v38 = vpop.f32.mrf.mxu1 }
 0x2ef   : > { %v4732_v6 = vpop.f32.mrf.mxu0 }
 0x2f0   : > { %v4733_v45 = vadd.f32 %v4732_v6, %v4692_v36 }
 0x2f1   : > { %v4734_v16 = vpop.f32.mrf.mxu0 }
 0x2f2   : > { %v4735_v51 = vadd.f32 %v4734_v16, %v4694_v13 }
 0x2f3   : > { %v4736_v43 = vpop.f32.mrf.mxu0 }
 0x2f5   : > { %v4737_v47 = vpop.f32.mrf.mxu0 }
 0x2fc   : > { %v4773_v48 = vpop.f32.mrf.mxu1 }
 0x2fd   : > { %v4774_v52 = vadd.f32 %v4773_v48, %v4733_v45 }
 0x2fe   : > { %v4775_v55 = vpop.f32.mrf.mxu1 }
 0x2ff   : > { %5020 = vst [vmem:[%s7282_s27] sm:$0xff] %v4774_v52  ;;  %v4776_v19 = vadd.f32 %v4775_v55, %v4735_v51 }
 0x300   : > { %v4777_v26 = vpop.f32.mrf.mxu1 }
 0x301   : > { %5021 = vst [vmem:[%s7282_s27 + $0x8] sm:$0xff] %v4776_v19 }
 0x302   : > { %v4778_v56 = vpop.f32.mrf.mxu1 }
 0x30f   : > { %v5737_v57 = vpop.f32.mrf.mxu0 }
 0x311   : > { %v5738_v58 = vpop.f32.mrf.mxu0 }
 0x312   : > { %v5739_v59 = vadd.f32 %v5738_v58, %v5737_v57 }
 0x313   : > { %v5740_v61 = vpop.f32.mrf.mxu0 }
 0x314   : > { %v4815_v60 = vadd.f32 %v5739_v59, %v2994_v11 }
 0x315   : > { %v5741_v54 = vpop.f32.mrf.mxu0 }
 0x31c   : > { %v5759_v62 = vpop.f32.mrf.mxu1 }
 0x31e   : > { %v5760_v63 = vpop.f32.mrf.mxu1 }
 0x31f   : > { %v5761_v8 = vadd.f32 %v5760_v63, %v5759_v62 }
 0x320   : > { %v5762_v39 = vpop.f32.mrf.mxu1 }
 0x321   : > { %v4855_v22 = vadd.f32 %v5761_v8, %v4815_v60 }
 0x322   : > { %v5763_v40 = vpop.f32.mrf.mxu1 }
 0x32f   : > { %v5781_v1 = vpop.f32.mrf.mxu0 }
 0x331   : > { %v5782_v50 = vpop.f32.mrf.mxu0 }
 0x332   : > { %v5783_v17 = vadd.f32 %v5782_v50, %v5781_v1 }
 0x333   : > { %v5784_v2 = vpop.f32.mrf.mxu0 }
 0x334   : > { %v4895_v41 = vadd.f32 %v5783_v17, %v4855_v22 }
 0x335   : > { %v5785_v25 = vpop.f32.mrf.mxu0 }
 0x33c   : > { %v5803_v3 = vpop.f32.mrf.mxu1 }
 0x33e   : > { %v5804_v4 = vpop.f32.mrf.mxu1 }
 0x33f   : > { %v5805_v44 = vadd.f32 %v5804_v4, %v5803_v3 }
 0x340   : > { %v5806_v7 = vpop.f32.mrf.mxu1 }
 0x341   : > { %v4935_v24 = vadd.f32 %v5805_v44, %v4895_v41 }
 0x342   : > { %v5807_v10 = vpop.f32.mrf.mxu1 }
 0x34f   : > { %v5825_v53 = vpop.f32.mrf.mxu0 }
 0x351   : > { %v5826_v14 = vpop.f32.mrf.mxu0 }
 0x352   : > { %v5827_v20 = vadd.f32 %v5826_v14, %v5825_v53 }
 0x353   : > { %v5828_v15 = vpop.f32.mrf.mxu0 }
 0x354   : > { %v4975_v28 = vadd.f32 %v5827_v20, %v4935_v24 }
 0x355   : > { %v5829_v46 = vpop.f32.mrf.mxu0 }
 0x35c   : > { %v5847_v23 = vpop.f32.mrf.mxu1 }
 0x35e   : > { %v5848_v12 = vpop.f32.mrf.mxu1 }
 0x35f   : > { %v5849_v49 = vadd.f32 %v5848_v12, %v5847_v23 }
 0x360   : > { %v5850_v35 = vpop.f32.mrf.mxu1 }
 0x361   : > { %v5015_v29 = vadd.f32 %v5849_v49, %v4975_v28 }
 0x362   : > { %v5851_v30 = vpop.f32.mrf.mxu1 }
 0x363   : > { %5022 = vst [vmem:[%s7282_s27 + $0x10] sm:$0xff] %v5015_v29 }
 0x364   : > { %6855 = shalt.err (!%p6852_p5)
}
 0x365   : > { %s6856_s30 = scalar_lea.hbm %s7293_s1, 384  ;;  %s6860_s15 = scalar_lea.hbm %s7341_s5, 768 }
 0x366   : > { %p6857_p10 = scmp.ne.s32.totalorder %s7293_s1, %s6856_s30  ;;  %p6861_p6 = scmp.lt.s32.totalorder %s7293_s1, %s7341_s5 }
 0x367   : > { %p6862_p12 = scmp.lt.s32.totalorder %s6860_s15, %s6856_s30 }
 0x368   : > { %p6858_p1 = pnand %p6857_p10, %p7062_p7 }
 0x369   : > { %p6863_p3 = por %p6862_p12, %p6861_p6 }
 0x36a   : > { %p6859_p4 = pneg %p6858_p1 }
 0x36c   : > { %p6864_p8 = pnand %p6863_p3, %p6859_p4 }
 0x36e   : > { %6867 = shalt.err (!%p6864_p8)
}
 0x36f   : > { %5867 = dma.vmem_to_hbm [thread:$0]  (%p7062_p7), %s5039_s6, 384, %s7293_s1, %s5024_s10  }
 0x370 PF: > { %s5050_s24 = sand.u32 1, %s6906_s18   ;;  %p7359_p9 = scmp.ne.s32.totalorder %s7350_s29, 0 }
 0x371   : > { %p7360_p11 = scmp.ge.s32.totalorder %s6926_s23, 2  ;;  %s5051_s27 = scalar_lea.sflag [#allocation4], %s5050_s24 }
 0x373   : > { %p5881_p2 = pnand %p7360_p11, %p7359_p9 }
 0x375   : > { %p5882_p13 = pneg %p5881_p2 }
 0x377   : > { %6901 = dma.done.wait (%p5882_p13), %s5051_s27, 384  }
 0x378   : > { %6903 = vsyncadd (%p5882_p13), %s5051_s27, 4294966912  ;;  %s22_s23 = sadd.s32 1, %s6926_s23   ;;  %s7361_s18 = smov %s6910_s19 }
 0x379   : > { %p19_p0 = scmp.ge.s32.totalorder %s22_s23, 4   ;;  %s7362_s19 = smov %s6914_s20 }
 0x37a   : > { %s7363_s20 = smov %s7074_s14  ;;  %s7364_s21 = smov %s6922_s22 }
 0x37b   : > { %s7365_s22 = smov %s7367_s7  ;;  %21 = sbr.rel (!%p19_p0) target bundleno = 10 (0xa), region = 93 }
 0x380   :  { %5056 = vsyncpa [#allocation3], 1 }
 0x381   :  { %5058 = vsyncpa [#allocation3 + $0x1], 1 }
 0x382   :  { %5059 = vsyncpa [#allocation6], 1 }
 0x383   :  { %5060 = vsyncpa [#allocation4], 1 }
 0x384   :  { %5062 = vsyncpa [#allocation4 + $0x1], 1 }

</bundles_post_ra>
